<compile_context>
chip_gen: v7x
topology: tpu7x:2x2x1
jax: 0.10.0
libtpu: 0.0.40
codegen_flags: <defaults>
</compile_context>

<pallas_src>
import jax
import jax.numpy as jnp
from jax.experimental import pallas as pl
from jax.experimental.pallas import tpu as pltpu


HIDDEN = 256
TB_MAX = 2048  # safe under v5e's 16 MiB scoped-VMEM default; raise + set
               # pltpu.CompilerParams(vmem_limit_bytes=...) for >=4096 on v6e.


def _round_up(x, m):
    return (x + m - 1) // m * m


def _pick_tb(batch):
    """Balanced batch tile: <= TB_MAX rows, multiple of 128, >=2 tiles when possible."""
    if batch <= 128:
        return 128
    n_tiles = max(2, pl.cdiv(batch, TB_MAX))   # >=2 so both v7x TCs get work
    return min(TB_MAX, _round_up(pl.cdiv(batch, n_tiles), 128))


def _orthogonal(key, shape, gain):
    """Orthogonal init (torch.nn.init.orthogonal_ semantics)."""
    rows, cols = shape
    n = max(rows, cols)
    a = jax.random.normal(key, (n, n), dtype=jnp.float32)
    q, r = jnp.linalg.qr(a)
    d = jnp.diagonal(r)
    q = q * jnp.where(d >= 0, 1.0, -1.0)       # sign fix, robust to d == 0
    return (gain * q[:rows, :cols]).astype(jnp.float32)


def init_params(obs_dim, action_dim, key):
    """layer_init: orthogonal(std=sqrt(2)) weights, zero biases.

    Weights stored [in_features, out_features]; MXU-facing weights (layers 1
    and 2) in bf16, everything else f32.
    """
    d_in = obs_dim + action_dim
    k1, k2, k3 = jax.random.split(key, 3)
    gain = jnp.sqrt(2.0)
    # PyTorch Linear weight is [out, in]; store the transpose [in, out].
    w1 = _orthogonal(k1, (HIDDEN, d_in), gain).T.astype(jnp.bfloat16)     # [d_in, 256]
    w2 = _orthogonal(k2, (HIDDEN, HIDDEN), gain).T.astype(jnp.bfloat16)   # [256, 256]
    w3 = _orthogonal(k3, (1, HIDDEN), gain)                               # [1, 256] f32
    b1 = jnp.zeros((1, HIDDEN), jnp.float32)
    b2 = jnp.zeros((1, HIDDEN), jnp.float32)
    b3 = jnp.zeros((1, 1), jnp.float32)
    return (w1, b1, w2, b2, w3, b3)


def reward_model_kernel(x_ref, w1_ref, b1_ref, w2_ref, b2_ref, w3_ref, b3_ref,
                        o_ref):
    # f32 -> bf16 cast on the (idle) VPU: no separate HBM cast pre-pass needed.
    x = x_ref[...].astype(jnp.bfloat16)                               # [tb, d_in]

    # Layer 1: single MXU pass (bf16 in, f32 accumulate) + SiLU in f32.
    h1 = jnp.dot(x, w1_ref[...], preferred_element_type=jnp.float32) + b1_ref[...]
    h1 = h1 * jax.nn.sigmoid(h1)                                      # SiLU (VPU/EUP)

    # Layer 2: dominant 256x256 matmul (bf16 in, f32 accumulate) + SiLU.
    h2 = jnp.dot(h1.astype(jnp.bfloat16), w2_ref[...],
                 preferred_element_type=jnp.float32) + b2_ref[...]
    h2 = h2 * jax.nn.sigmoid(h2)                                      # SiLU

    # Layer 3 (out_features = 1): VPU multiply + lane reduce instead of an
    # N=1 MXU matmul; result stored lane-dense as a (1, tb) row.
    # TODO(synk): audit Mosaic dump that the sublane->lane relayout of `row`
    # stays in registers/XLU (no VMEM round-trip) at tb >= 2048.
    row = jnp.sum(h2 * w3_ref[...], axis=-1)                          # [tb]
    o_ref[...] = (row[None, :] + b3_ref[...]).astype(o_ref.dtype)


def _const_spec(shape, single_buffer):
    # Grid-invariant blocks (weights/biases): index_map is constant so they
    # stay resident in VMEM; single_buffer drops the redundant double buffer.
    if single_buffer:
        return pl.BlockSpec(shape, lambda i: (0, 0), pipeline_mode=pl.Buffered(1))
    return pl.BlockSpec(shape, lambda i: (0, 0))


def _build_and_run(x, w1, b1, w2, b2, w3, b3, *, tb, num_tiles, cost,
                   single_buffer_consts):
    d_in = x.shape[1]
    const = lambda s: _const_spec(s, single_buffer_consts)
    return pl.pallas_call(
        reward_model_kernel,
        out_shape=jax.ShapeDtypeStruct((num_tiles, tb), jnp.float32),
        grid_spec=pltpu.PrefetchScalarGridSpec(
            num_scalar_prefetch=0,
            grid=(num_tiles,),
            in_specs=[
                pl.BlockSpec((tb, d_in), lambda i: (i, 0)),   # fused [obs|act] tile, f32
                const((d_in, HIDDEN)),                        # w1
                const((1, HIDDEN)),                           # b1
                const((HIDDEN, HIDDEN)),                      # w2
                const((1, HIDDEN)),                           # b2
                const((1, HIDDEN)),                           # w3 (row)
                const((1, 1)),                                # b3
            ],
            out_specs=pl.BlockSpec((1, tb), lambda i: (i, 0)),  # lane-dense output
        ),
        compiler_params=pltpu.CompilerParams(
            dimension_semantics=("parallel",)),               # megacore-shardable
        cost_estimate=cost,
    )(x, w1, b1, w2, b2, w3, b3)


def reward_model_forward(obs, action, params, tb=None):
    """obs: [B, obs_dim], action: [B, action_dim] -> reward: [B] (float32)."""
    w1, b1, w2, b2, w3, b3 = params
    B = obs.shape[0]
    d_in = obs.shape[1] + action.shape[1]
    assert w1.shape == (d_in, HIDDEN)

    if tb is None:
        tb = _pick_tb(B)
    tb = _round_up(tb, 128)
    b_pad = _round_up(B, tb)
    num_tiles = b_pad // tb

    # Fused concat + batch pad, kept f32 (the bf16 cast happens in-kernel).
    x = jnp.concatenate([obs.astype(jnp.float32), action.astype(jnp.float32)],
                        axis=1)
    x = jnp.pad(x, ((0, b_pad - B), (0, 0)))

    flops = 2 * b_pad * (d_in * HIDDEN + HIDDEN * HIDDEN + HIDDEN)
    bytes_accessed = (4 * b_pad * d_in                       # f32 input
                      + 2 * (w1.size + w2.size)              # bf16 weights
                      + 4 * (b1.size + b2.size + w3.size + b3.size)
                      + 4 * b_pad)                           # f32 output
    cost = pl.CostEstimate(flops=int(flops),
                           transcendentals=int(2 * b_pad * HIDDEN),
                           bytes_accessed=int(bytes_accessed))

    try:
        out = _build_and_run(x, w1, b1, w2, b2, w3, b3, tb=tb,
                             num_tiles=num_tiles, cost=cost,
                             single_buffer_consts=True)
    except Exception:
        # Fallback if this JAX/libtpu rejects pipeline_mode=pl.Buffered(1):
        # identical kernel, constants just keep the default double buffering.
        out = _build_and_run(x, w1, b1, w2, b2, w3, b3, tb=tb,
                             num_tiles=num_tiles, cost=cost,
                             single_buffer_consts=False)

    return out.reshape(b_pad)[:B]                            # [B]


if __name__ == "__main__":
    obs_dim, action_dim, batch = 12, 4, 8

    key = jax.random.PRNGKey(0)
    k_obs, k_act, k_params = jax.random.split(key, 3)

    obs = jax.random.normal(k_obs, (batch, obs_dim), dtype=jnp.float32)
    action = jax.random.normal(k_act, (batch, action_dim), dtype=jnp.float32)
    params = init_params(obs_dim, action_dim, k_params)

    reward = reward_model_forward(obs, action, params)
    reward = jax.block_until_ready(reward)

    assert reward.shape == (batch,), reward.shape
    assert reward.dtype == jnp.float32

    # Pure-JAX reference mirroring the kernel's dtype policy
    # (bf16 MXU inputs, f32 accumulation, f32 elementwise).
    w1, b1, w2, b2, w3, b3 = params
    x = jnp.concatenate([obs, action], axis=1)
    h1 = jnp.dot(x.astype(jnp.bfloat16), w1,
                 preferred_element_type=jnp.float32) + b1
    h1 = h1 * jax.nn.sigmoid(h1)
    h2 = jnp.dot(h1.astype(jnp.bfloat16), w2,
                 preferred_element_type=jnp.float32) + b2
    h2 = h2 * jax.nn.sigmoid(h2)
    ref = jnp.sum(h2 * w3, axis=-1) + b3[0, 0]

    assert jnp.allclose(reward, ref, atol=1e-3, rtol=1e-3), \
        float(jnp.max(jnp.abs(reward - ref)))

    print("KERNEL_OK")
</pallas_src>

<mosaic_0001>
module attributes {stable_mosaic.version = 11 : i64} {
  func.func @reward_model_kernel(%arg0: i32, %arg1: memref<128x16xf32, #tpu.memory_space<vmem>>, %arg2: memref<16x256xbf16, #tpu.memory_space<vmem>>, %arg3: memref<1x256xf32, #tpu.memory_space<vmem>>, %arg4: memref<256x256xbf16, #tpu.memory_space<vmem>>, %arg5: memref<1x256xf32, #tpu.memory_space<vmem>>, %arg6: memref<1x256xf32, #tpu.memory_space<vmem>>, %arg7: memref<1x1xf32, #tpu.memory_space<vmem>>, %arg8: memref<1x128xf32, #tpu.memory_space<vmem>>) attributes {dimension_semantics = [#tpu.dimension_semantics<parallel>], iteration_bounds = array<i64: 1>, scalar_prefetch = 0 : i64, scratch_operands = 0 : i64, tpu.core_type = #tpu.core_type<tc>, window_params = [{transform_indices = @transform_0, window_bounds = array<i64: 128, 16>}, {pipeline_mode = #tpu.pipeline_mode<synchronous>, transform_indices = @transform_1, window_bounds = array<i64: 16, 256>}, {pipeline_mode = #tpu.pipeline_mode<synchronous>, transform_indices = @transform_2, window_bounds = array<i64: 1, 256>}, {pipeline_mode = #tpu.pipeline_mode<synchronous>, transform_indices = @transform_3, window_bounds = array<i64: 256, 256>}, {pipeline_mode = #tpu.pipeline_mode<synchronous>, transform_indices = @transform_4, window_bounds = array<i64: 1, 256>}, {pipeline_mode = #tpu.pipeline_mode<synchronous>, transform_indices = @transform_5, window_bounds = array<i64: 1, 256>}, {pipeline_mode = #tpu.pipeline_mode<synchronous>, transform_indices = @transform_6, window_bounds = array<i64: 1, 1>}, {transform_indices = @transform_7, window_bounds = array<i64: 1, 128>}]} {
    %c0 = arith.constant 0 : index
    %c0_0 = arith.constant 0 : index
    %0 = vector.load %arg1[%c0, %c0_0] : memref<128x16xf32, #tpu.memory_space<vmem>>, vector<128x16xf32>
    %1 = arith.truncf %0 : vector<128x16xf32> to vector<128x16xbf16>
    %c0_1 = arith.constant 0 : index
    %c0_2 = arith.constant 0 : index
    %2 = vector.load %arg2[%c0_1, %c0_2] : memref<16x256xbf16, #tpu.memory_space<vmem>>, vector<16x256xbf16>
    %cst = arith.constant dense<0.000000e+00> : vector<128x256xf32>
    %3 = tpu.matmul %1, %2, %cst {dimension_numbers = #tpu.dot_dimension_numbers<[1], [0], [0], [1], [0, 0, 1, 1], [], []>} : vector<128x16xbf16>, vector<16x256xbf16>, vector<128x256xf32> -> vector<128x256xf32>
    %c0_3 = arith.constant 0 : index
    %c0_4 = arith.constant 0 : index
    %4 = vector.load %arg3[%c0_3, %c0_4] : memref<1x256xf32, #tpu.memory_space<vmem>>, vector<1x256xf32>
    %5 = vector.broadcast %4 : vector<1x256xf32> to vector<128x256xf32>
    %6 = arith.addf %3, %5 : vector<128x256xf32>
    %7 = arith.negf %6 : vector<128x256xf32>
    %8 = math.exp %7 : vector<128x256xf32>
    %cst_5 = arith.constant 1.000000e+00 : f32
    %9 = vector.broadcast %cst_5 : f32 to vector<128x256xf32>
    %10 = arith.addf %9, %8 : vector<128x256xf32>
    %11 = arith.divf %9, %10 : vector<128x256xf32>
    %12 = arith.mulf %6, %11 : vector<128x256xf32>
    %13 = arith.truncf %12 : vector<128x256xf32> to vector<128x256xbf16>
    %c0_6 = arith.constant 0 : index
    %c0_7 = arith.constant 0 : index
    %14 = vector.load %arg4[%c0_6, %c0_7] : memref<256x256xbf16, #tpu.memory_space<vmem>>, vector<256x256xbf16>
    %cst_8 = arith.constant dense<0.000000e+00> : vector<128x256xf32>
    %15 = tpu.matmul %13, %14, %cst_8 {dimension_numbers = #tpu.dot_dimension_numbers<[1], [0], [0], [1], [0, 0, 1, 1], [], []>} : vector<128x256xbf16>, vector<256x256xbf16>, vector<128x256xf32> -> vector<128x256xf32>
    %c0_9 = arith.constant 0 : index
    %c0_10 = arith.constant 0 : index
    %16 = vector.load %arg5[%c0_9, %c0_10] : memref<1x256xf32, #tpu.memory_space<vmem>>, vector<1x256xf32>
    %17 = vector.broadcast %16 : vector<1x256xf32> to vector<128x256xf32>
    %18 = arith.addf %15, %17 : vector<128x256xf32>
    %19 = arith.negf %18 : vector<128x256xf32>
    %20 = math.exp %19 : vector<128x256xf32>
    %cst_11 = arith.constant 1.000000e+00 : f32
    %21 = vector.broadcast %cst_11 : f32 to vector<128x256xf32>
    %22 = arith.addf %21, %20 : vector<128x256xf32>
    %23 = arith.divf %21, %22 : vector<128x256xf32>
    %24 = arith.mulf %18, %23 : vector<128x256xf32>
    %c0_12 = arith.constant 0 : index
    %c0_13 = arith.constant 0 : index
    %25 = vector.load %arg6[%c0_12, %c0_13] : memref<1x256xf32, #tpu.memory_space<vmem>>, vector<1x256xf32>
    %26 = vector.broadcast %25 : vector<1x256xf32> to vector<128x256xf32>
    %27 = arith.mulf %24, %26 : vector<128x256xf32>
    %cst_14 = arith.constant dense<0.000000e+00> : vector<128xf32>
    %28 = vector.multi_reduction <add>, %27, %cst_14 [1] : vector<128x256xf32> to vector<128xf32>
    %29 = vector.shape_cast %28 : vector<128xf32> to vector<1x128xf32>
    %c0_15 = arith.constant 0 : index
    %c0_16 = arith.constant 0 : index
    %30 = vector.load %arg7[%c0_15, %c0_16] : memref<1x1xf32, #tpu.memory_space<vmem>>, vector<1x1xf32>
    %31 = vector.broadcast %30 : vector<1x1xf32> to vector<1x128xf32>
    %32 = arith.addf %29, %31 : vector<1x128xf32>
    %c0_17 = arith.constant 0 : index
    %c0_18 = arith.constant 0 : index
    %33 = vector.load %arg8[%c0_17, %c0_18] : memref<1x128xf32, #tpu.memory_space<vmem>>, vector<1x128xf32>
    tpu.vector_store %arg8[%c0_17, %c0_18], %32 {strides = array<i32>} : memref<1x128xf32, #tpu.memory_space<vmem>>, vector<1x128xf32>,
    return
  }
  func.func @transform_0(%arg0: i32) -> (i32, i32) {
    %c0_i32 = arith.constant 0 : i32
    %c0_i32_0 = arith.constant 0 : i32
    return %arg0, %c0_i32 : i32, i32
  }
  func.func @transform_1(%arg0: i32) -> (i32, i32) {
    %c0_i32 = arith.constant 0 : i32
    %c0_i32_0 = arith.constant 0 : i32
    %c0_i32_1 = arith.constant 0 : i32
    return %c0_i32, %c0_i32_0 : i32, i32
  }
  func.func @transform_2(%arg0: i32) -> (i32, i32) {
    %c0_i32 = arith.constant 0 : i32
    %c0_i32_0 = arith.constant 0 : i32
    %c0_i32_1 = arith.constant 0 : i32
    return %c0_i32, %c0_i32_0 : i32, i32
  }
  func.func @transform_3(%arg0: i32) -> (i32, i32) {
    %c0_i32 = arith.constant 0 : i32
    %c0_i32_0 = arith.constant 0 : i32
    %c0_i32_1 = arith.constant 0 : i32
    return %c0_i32, %c0_i32_0 : i32, i32
  }
  func.func @transform_4(%arg0: i32) -> (i32, i32) {
    %c0_i32 = arith.constant 0 : i32
    %c0_i32_0 = arith.constant 0 : i32
    %c0_i32_1 = arith.constant 0 : i32
    return %c0_i32, %c0_i32_0 : i32, i32
  }
  func.func @transform_5(%arg0: i32) -> (i32, i32) {
    %c0_i32 = arith.constant 0 : i32
    %c0_i32_0 = arith.constant 0 : i32
    %c0_i32_1 = arith.constant 0 : i32
    return %c0_i32, %c0_i32_0 : i32, i32
  }
  func.func @transform_6(%arg0: i32) -> (i32, i32) {
    %c0_i32 = arith.constant 0 : i32
    %c0_i32_0 = arith.constant 0 : i32
    %c0_i32_1 = arith.constant 0 : i32
    return %c0_i32, %c0_i32_0 : i32, i32
  }
  func.func @transform_7(%arg0: i32) -> (i32, i32) {
    %c0_i32 = arith.constant 0 : i32
    %c0_i32_0 = arith.constant 0 : i32
    return %arg0, %c0_i32 : i32, i32
  }
}

module attributes {stable_mosaic.version = 11 : i64} {
  func.func @reward_model_kernel(%arg0: i32, %arg1: memref<128x16xf32, #tpu.memory_space<vmem>>, %arg2: memref<16x256xbf16, #tpu.memory_space<vmem>>, %arg3: memref<1x256xf32, #tpu.memory_space<vmem>>, %arg4: memref<256x256xbf16, #tpu.memory_space<vmem>>, %arg5: memref<1x256xf32, #tpu.memory_space<vmem>>, %arg6: memref<1x256xf32, #tpu.memory_space<vmem>>, %arg7: memref<1x1xf32, #tpu.memory_space<vmem>>, %arg8: memref<1x128xf32, #tpu.memory_space<vmem>>) attributes {dimension_semantics = [#tpu.dimension_semantics<parallel>], iteration_bounds = array<i64: 1>, scalar_prefetch = 0 : i64, scratch_operands = 0 : i64, tpu.core_type = #tpu.core_type<tc>, window_params = [{transform_indices = @transform_0, window_bounds = array<i64: 128, 16>}, {pipeline_mode = #tpu.pipeline_mode<synchronous>, transform_indices = @transform_1, window_bounds = array<i64: 16, 256>}, {pipeline_mode = #tpu.pipeline_mode<synchronous>, transform_indices = @transform_2, window_bounds = array<i64: 1, 256>}, {pipeline_mode = #tpu.pipeline_mode<synchronous>, transform_indices = @transform_3, window_bounds = array<i64: 256, 256>}, {pipeline_mode = #tpu.pipeline_mode<synchronous>, transform_indices = @transform_4, window_bounds = array<i64: 1, 256>}, {pipeline_mode = #tpu.pipeline_mode<synchronous>, transform_indices = @transform_5, window_bounds = array<i64: 1, 256>}, {pipeline_mode = #tpu.pipeline_mode<synchronous>, transform_indices = @transform_6, window_bounds = array<i64: 1, 1>}, {transform_indices = @transform_7, window_bounds = array<i64: 1, 128>}]} {
    %c0 = arith.constant 0 : index
    %c0_0 = arith.constant 0 : index
    %0 = vector.load %arg1[%c0, %c0_0] : memref<128x16xf32, #tpu.memory_space<vmem>>, vector<128x16xf32>
    %1 = arith.truncf %0 : vector<128x16xf32> to vector<128x16xbf16>
    %c0_1 = arith.constant 0 : index
    %c0_2 = arith.constant 0 : index
    %2 = vector.load %arg2[%c0_1, %c0_2] : memref<16x256xbf16, #tpu.memory_space<vmem>>, vector<16x256xbf16>
    %cst = arith.constant dense<0.000000e+00> : vector<128x256xf32>
    %3 = tpu.matmul %1, %2, %cst {dimension_numbers = #tpu.dot_dimension_numbers<[1], [0], [0], [1], [0, 0, 1, 1], [], []>} : vector<128x16xbf16>, vector<16x256xbf16>, vector<128x256xf32> -> vector<128x256xf32>
    %c0_3 = arith.constant 0 : index
    %c0_4 = arith.constant 0 : index
    %4 = vector.load %arg3[%c0_3, %c0_4] : memref<1x256xf32, #tpu.memory_space<vmem>>, vector<1x256xf32>
    %5 = vector.broadcast %4 : vector<1x256xf32> to vector<128x256xf32>
    %6 = arith.addf %3, %5 : vector<128x256xf32>
    %7 = arith.negf %6 : vector<128x256xf32>
    %8 = math.exp %7 : vector<128x256xf32>
    %cst_5 = arith.constant 1.000000e+00 : f32
    %9 = vector.broadcast %cst_5 : f32 to vector<128x256xf32>
    %10 = arith.addf %9, %8 : vector<128x256xf32>
    %11 = arith.divf %9, %10 : vector<128x256xf32>
    %12 = arith.mulf %6, %11 : vector<128x256xf32>
    %13 = arith.truncf %12 : vector<128x256xf32> to vector<128x256xbf16>
    %c0_6 = arith.constant 0 : index
    %c0_7 = arith.constant 0 : index
    %14 = vector.load %arg4[%c0_6, %c0_7] : memref<256x256xbf16, #tpu.memory_space<vmem>>, vector<256x256xbf16>
    %cst_8 = arith.constant dense<0.000000e+00> : vector<128x256xf32>
    %15 = tpu.matmul %13, %14, %cst_8 {dimension_numbers = #tpu.dot_dimension_numbers<[1], [0], [0], [1], [0, 0, 1, 1], [], []>} : vector<128x256xbf16>, vector<256x256xbf16>, vector<128x256xf32> -> vector<128x256xf32>
    %c0_9 = arith.constant 0 : index
    %c0_10 = arith.constant 0 : index
    %16 = vector.load %arg5[%c0_9, %c0_10] : memref<1x256xf32, #tpu.memory_space<vmem>>, vector<1x256xf32>
    %17 = vector.broadcast %16 : vector<1x256xf32> to vector<128x256xf32>
    %18 = arith.addf %15, %17 : vector<128x256xf32>
    %19 = arith.negf %18 : vector<128x256xf32>
    %20 = math.exp %19 : vector<128x256xf32>
    %cst_11 = arith.constant 1.000000e+00 : f32
    %21 = vector.broadcast %cst_11 : f32 to vector<128x256xf32>
    %22 = arith.addf %21, %20 : vector<128x256xf32>
    %23 = arith.divf %21, %22 : vector<128x256xf32>
    %24 = arith.mulf %18, %23 : vector<128x256xf32>
    %c0_12 = arith.constant 0 : index
    %c0_13 = arith.constant 0 : index
    %25 = vector.load %arg6[%c0_12, %c0_13] : memref<1x256xf32, #tpu.memory_space<vmem>>, vector<1x256xf32>
    %26 = vector.broadcast %25 : vector<1x256xf32> to vector<128x256xf32>
    %27 = arith.mulf %24, %26 : vector<128x256xf32>
    %cst_14 = arith.constant dense<0.000000e+00> : vector<128xf32>
    %28 = vector.multi_reduction <add>, %27, %cst_14 [1] : vector<128x256xf32> to vector<128xf32>
    %29 = vector.shape_cast %28 : vector<128xf32> to vector<1x128xf32>
    %c0_15 = arith.constant 0 : index
    %c0_16 = arith.constant 0 : index
    %30 = vector.load %arg7[%c0_15, %c0_16] : memref<1x1xf32, #tpu.memory_space<vmem>>, vector<1x1xf32>
    %31 = vector.broadcast %30 : vector<1x1xf32> to vector<1x128xf32>
    %32 = arith.addf %29, %31 : vector<1x128xf32>
    %c0_17 = arith.constant 0 : index
    %c0_18 = arith.constant 0 : index
    %33 = vector.load %arg8[%c0_17, %c0_18] : memref<1x128xf32, #tpu.memory_space<vmem>>, vector<1x128xf32>
    tpu.vector_store %arg8[%c0_17, %c0_18], %32 {strides = array<i32>} : memref<1x128xf32, #tpu.memory_space<vmem>>, vector<1x128xf32>,
    return
  }
  func.func @transform_0(%arg0: i32) -> (i32, i32) {
    %c0_i32 = arith.constant 0 : i32
    %c0_i32_0 = arith.constant 0 : i32
    return %arg0, %c0_i32 : i32, i32
  }
  func.func @transform_1(%arg0: i32) -> (i32, i32) {
    %c0_i32 = arith.constant 0 : i32
    %c0_i32_0 = arith.constant 0 : i32
    %c0_i32_1 = arith.constant 0 : i32
    return %c0_i32, %c0_i32_0 : i32, i32
  }
  func.func @transform_2(%arg0: i32) -> (i32, i32) {
    %c0_i32 = arith.constant 0 : i32
    %c0_i32_0 = arith.constant 0 : i32
    %c0_i32_1 = arith.constant 0 : i32
    return %c0_i32, %c0_i32_0 : i32, i32
  }
  func.func @transform_3(%arg0: i32) -> (i32, i32) {
    %c0_i32 = arith.constant 0 : i32
    %c0_i32_0 = arith.constant 0 : i32
    %c0_i32_1 = arith.constant 0 : i32
    return %c0_i32, %c0_i32_0 : i32, i32
  }
  func.func @transform_4(%arg0: i32) -> (i32, i32) {
    %c0_i32 = arith.constant 0 : i32
    %c0_i32_0 = arith.constant 0 : i32
    %c0_i32_1 = arith.constant 0 : i32
    return %c0_i32, %c0_i32_0 : i32, i32
  }
  func.func @transform_5(%arg0: i32) -> (i32, i32) {
    %c0_i32 = arith.constant 0 : i32
    %c0_i32_0 = arith.constant 0 : i32
    %c0_i32_1 = arith.constant 0 : i32
    return %c0_i32, %c0_i32_0 : i32, i32
  }
  func.func @transform_6(%arg0: i32) -> (i32, i32) {
    %c0_i32 = arith.constant 0 : i32
    %c0_i32_0 = arith.constant 0 : i32
    %c0_i32_1 = arith.constant 0 : i32
    return %c0_i32, %c0_i32_0 : i32, i32
  }
  func.func @transform_7(%arg0: i32) -> (i32, i32) {
    %c0_i32 = arith.constant 0 : i32
    %c0_i32_0 = arith.constant 0 : i32
    return %arg0, %c0_i32 : i32, i32
  }
}

</mosaic_0001>

<bundles_post_ra>
// kernel: tpu_custom_call.1
= control target key start
LH: loop header
LB: loop body
LE: loop exit
PB: predicated region body
PF: predicated region fallthrough
CT: control target
= control target key end

     0   :  { %s2362_s0 = inlined_call_operand.vmem [shape: f32[128,16], index: 0, kind: input, shape index: {}]   ;;  %s2363_s1 = inlined_call_operand.vmem [shape: bf16[16,256], index: 1, kind: input, shape index: {}]   ;;  %s2364_s2 = inlined_call_operand.vmem [shape: f32[1,256], index: 2, kind: input, shape index: {}]   ;;  %s2365_s3 = inlined_call_operand.hbm [shape: bf16[256,256], index: 3, kind: input, shape index: {}]   ;;  %s2366_s4 = inlined_call_operand.vmem [shape: f32[1,256], index: 4, kind: input, shape index: {}]   ;;  %s2367_s5 = inlined_call_operand.vmem [shape: f32[1,256], index: 5, kind: input, shape index: {}]   ;;  %s2368_s6 = inlined_call_operand.<no memory space> [shape: f32[1,1], index: 6, kind: input, shape index: {}]   ;;  %s2369_s7 = inlined_call_operand.hbm [shape: f32[1,128], index: 7, kind: output, shape index: {}]  }
   0x1   :  { %v12_v0 = vstv %s2368_s6 }
   0x2   :  { %13 = vst [vmem:[#allocation2] sm:$0x1] %v12_v0 }
   0x3   :  { %14 = vsyncpa [#allocation4], 0 }
   0x4   :  { %15 = vsyncpa [#allocation5], 0  ;;  %s1773_s26 = smov [#allocation3]   ;;  %s1725_s30 = scalar_lea.hbm %s2365_s3, 4096 }
   0x5   :  { %s27_s27 = sshll.u32 %s1773_s26, 4  ;;  %p1726_p0 = scmp.ne.s32.totalorder %s2365_s3, %s1725_s30  ;;  %s28_s27 = int_to_ptr.vmem [resolvable:$true] %s27_s27 }
   0x6   :  { %p1729_p1 = scmp.lt.u32.totalorder %s1725_s30, %s2365_s3 }
   0x8   :  { %p1731_p2 = pnand %p1729_p1, %p1726_p0 }
   0xa   :  { %1734 = shalt.err (!%p1731_p2)
}
   0xb   :  { %s1735_s6 = scalar_lea.vmem %s28_s27, 4096  ;;  %p1740_p4 = scmp.lt.s32.totalorder %s28_s27, %s28_s27 }
   0xc   :  { %p1736_p3 = scmp.ne.s32.totalorder %s28_s27, %s1735_s6  ;;  %p1741_p5 = scmp.lt.s32.totalorder %s1735_s6, %s1735_s6 }
   0xe   :  { %p1742_p6 = por %p1741_p5, %p1740_p4 }
  0x10   :  { %p1743_p7 = pnand %p1742_p6, %p1736_p3 }
  0x12   :  { %1746 = shalt.err (!%p1743_p7)
}
  0x13   :  { %s1774_s12 = smov 128   ;;  %s1775_s13 = smov 8  }
  0x14   :  { %33 = dma.hbm_to_vmem [thread:$0]  %s2365_s3, 4096, %s28_s27, [#allocation4], %s1774_s12, %s1774_s12, %s1775_s13  }
  0x15   :  { %1769 = dma.done.wait [#allocation4], 4096  }
  0x16   :  { %1770 = vsyncadd [#allocation4], 4294963200  ;;  %v1776_v1 = vmov 0   ;;  %v1418_v2 = vld [vmem:[%s2363_s1 + $0x4] ss:$8 sps:$4 sm:$0xff]   ;;  %vm92_vm0 = vcmask 130048   ;;  %v72_v60 = vlaneseq }
  0x17   :  { %149 = vmatprep.mubr.bf16.mxu0 %v1776_v1  ;;  %1416 = vset.pattern.permute.xlu1 %v1776_v1  ;;  %v1420_v3 = vld [vmem:[%s2363_s1] ss:$8 sps:$4 sm:$0xff]   ;;  %v46_v7 = vld [vmem:[%s2362_s0 + $0x10] sm:$0xff]  ;;  %v47_v8 = vld [vmem:[%s2362_s0 + $0x18] sm:$0xff]  ;;  %vm1156_vm1 = vcmask 130112   ;;  %vm1163_vm2 = vcmask 195712  }
  0x18   :  { %1417 = vset.pattern.permute.xlu0 %v1776_v1  ;;  %v44_v4 = vld [vmem:[%s2362_s0] sm:$0xff]  ;;  %v45_v5 = vld [vmem:[%s2362_s0 + $0x8] sm:$0xff]  ;;  %117 = vmatprep.subr.bf16.mxu0 %v1418_v2  ;;  %v61_v12 = vpack.c.bf16 %v47_v8, %v46_v7  ;;  %v1424_v13 = vld [vmem:[#allocation3 + $0x10] ss:$8 sps:$4 sm:$0xff]   ;;  %v1906_v61 = vshrl.u32 %v72_v60, 7  ;;  %vm1170_vm3 = vcmask 261312  }
  0x19   :  { %v60_v6 = vpack.c.bf16 %v45_v5, %v44_v4  ;;  %118 = vmatpush1.bf16.msra.mxu0 %v1420_v3  ;;  %v1421_v9 = vld [vmem:[#allocation3] ss:$8 sps:$4 sm:$0xff]   ;;  %v1423_v10 = vld [vmem:[#allocation3 + $0x4] ss:$8 sps:$4 sm:$0xff]   ;;  %v1426_v11 = vld [vmem:[#allocation3 + $0x14] ss:$8 sps:$4 sm:$0xff]  }
  0x1a   :  { %674 = vmatprep.subr.bf16.mxu0 %v1423_v10  ;;  %1379 = vmatprep.subr.bf16.mxu1 %v1423_v10  ;;  %v1429_v14 = vld [vmem:[#allocation3 + $0x24] ss:$8 sps:$4 sm:$0xff]   ;;  %v1427_v17 = vld [vmem:[#allocation3 + $0x20] ss:$8 sps:$4 sm:$0xff]   ;;  %v1432_v18 = vld [vmem:[#allocation3 + $0x34] ss:$8 sps:$4 sm:$0xff]  }
  0x1b   :  { %1395 = vmatpush1.bf16.msra.mxu1 %v1421_v9  ;;  %v48_v15 = vld [vmem:[%s2362_s0 + $0x20] sm:$0xff]  ;;  %v49_v16 = vld [vmem:[%s2362_s0 + $0x28] sm:$0xff]  ;;  %v1430_v19 = vld [vmem:[#allocation3 + $0x30] ss:$8 sps:$4 sm:$0xff]   ;;  %v1909_v62 = vsub.s32 0, %v1906_v61  ;;  %v1915_v0 = vsub.s32 1, %v1906_v61 }
  0x1c   :  { %1275 = vmatmul.mubr.msk.bf16.vlgmr.msra.gmra.mrb[0].mxu0 %vm92_vm0, %v60_v6  ;;  %1380 = vmatprep.subr.bf16.mxu1 %v1426_v11  ;;  %v62_v20 = vpack.c.bf16 %v49_v16, %v48_v15  ;;  %v1435_v21 = vld [vmem:[#allocation3 + $0x44] ss:$8 sps:$4 sm:$0xff]   ;;  %v51_v23 = vld [vmem:[%s2362_s0 + $0x38] sm:$0xff]  ;;  %v1433_v24 = vld [vmem:[#allocation3 + $0x40] ss:$8 sps:$4 sm:$0xff]   ;;  %vm1177_vm4 = vcmask 326912  }
  0x1d   :  { %159 = vmatprep.mubr.bf16.mxu0 %v1776_v1  ;;  %675 = vmatpush1.bf16.msra.mxu0 %v1421_v9  ;;  %v50_v22 = vld [vmem:[%s2362_s0 + $0x30] sm:$0xff]  ;;  %v52_v29 = vld [vmem:[%s2362_s0 + $0x40] sm:$0xff]  ;;  %v53_v30 = vld [vmem:[%s2362_s0 + $0x48] sm:$0xff]  ;;  %vm1184_vm5 = vcmask 392512   ;;  %vm1191_vm6 = vcmask 458112   ;;  %vm1198_vm7 = vcmask 523712  }
  0x1e   :  { %676 = vmatprep.subr.bf16.mxu0 %v1426_v11  ;;  %v1438_v25 = vld [vmem:[#allocation3 + $0x54] ss:$8 sps:$4 sm:$0xff]   ;;  %v63_v26 = vpack.c.bf16 %v51_v23, %v50_v22  ;;  %v1436_v27 = vld [vmem:[#allocation3 + $0x50] ss:$8 sps:$4 sm:$0xff]   ;;  %v1441_v28 = vld [vmem:[#allocation3 + $0x64] ss:$8 sps:$4 sm:$0xff]   ;;  %v64_v32 = vpack.c.bf16 %v53_v30, %v52_v29 }
  0x1f   :  { %1396 = vmatpush1.bf16.msra.mxu1 %v1424_v13  ;;  %v1439_v31 = vld [vmem:[#allocation3 + $0x60] ss:$8 sps:$4 sm:$0xff]   ;;  %v54_v33 = vld [vmem:[%s2362_s0 + $0x50] sm:$0xff]  ;;  %v55_v34 = vld [vmem:[%s2362_s0 + $0x58] sm:$0xff]  ;;  %vm1205_vm8 = vcmask 589312   ;;  %vm1212_vm9 = vcmask 654912  }
  0x20   :  { %1381 = vmatprep.subr.bf16.mxu1 %v1429_v14  ;;  %v65_v35 = vpack.c.bf16 %v55_v34, %v54_v33  ;;  %v56_v36 = vld [vmem:[%s2362_s0 + $0x60] sm:$0xff]  ;;  %v57_v37 = vld [vmem:[%s2362_s0 + $0x68] sm:$0xff]  ;;  %v58_v39 = vld [vmem:[%s2362_s0 + $0x70] sm:$0xff]  ;;  %vm1219_vm10 = vcmask 720512   ;;  %vm1226_vm11 = vcmask 786112   ;;  %vm1233_vm12 = vcmask 851712  }
  0x21   :  { %677 = vmatpush1.bf16.msra.mxu0 %v1424_v13  ;;  %v66_v38 = vpack.c.bf16 %v57_v37, %v56_v36  ;;  %v59_v40 = vld [vmem:[%s2362_s0 + $0x78] sm:$0xff]  ;;  %v1447_v44 = vld [vmem:[#allocation3 + $0x84] ss:$8 sps:$4 sm:$0xff]   ;;  %v1445_v45 = vld [vmem:[#allocation3 + $0x80] ss:$8 sps:$4 sm:$0xff]   ;;  %vm1240_vm13 = vcmask 917312  }
  0x22   :  { %678 = vmatprep.subr.bf16.mxu0 %v1429_v14  ;;  %v67_v41 = vpack.c.bf16 %v59_v40, %v58_v39  ;;  %v1444_v42 = vld [vmem:[#allocation3 + $0x74] ss:$8 sps:$4 sm:$0xff]   ;;  %v1442_v43 = vld [vmem:[#allocation3 + $0x70] ss:$8 sps:$4 sm:$0xff]   ;;  %v1453_v48 = vld [vmem:[#allocation3 + $0xa4] ss:$8 sps:$4 sm:$0xff]  }
  0x23   :  { %1397 = vmatpush1.bf16.msra.mxu1 %v1427_v17  ;;  %v1450_v46 = vld [vmem:[#allocation3 + $0x94] ss:$8 sps:$4 sm:$0xff]   ;;  %v1448_v47 = vld [vmem:[#allocation3 + $0x90] ss:$8 sps:$4 sm:$0xff]   ;;  %v1451_v49 = vld [vmem:[#allocation3 + $0xa0] ss:$8 sps:$4 sm:$0xff]  }
  0x24   :  { %1276 = vmatmul.mubr.msk.bf16.gmra.mrb[4].mxu0 %vm92_vm0, %v61_v12  ;;  %1382 = vmatprep.subr.bf16.mxu1 %v1432_v18  ;;  %v1456_v50 = vld [vmem:[#allocation3 + $0xb4] ss:$8 sps:$4 sm:$0xff]   ;;  %v1454_v51 = vld [vmem:[#allocation3 + $0xb0] ss:$8 sps:$4 sm:$0xff]   ;;  %v1459_v52 = vld [vmem:[#allocation3 + $0xc4] ss:$8 sps:$4 sm:$0xff]  }
  0x25   :  { %169 = vmatprep.mubr.bf16.mxu0 %v1776_v1  ;;  %679 = vmatpush1.bf16.msra.mxu0 %v1427_v17  ;;  %v1457_v53 = vld [vmem:[#allocation3 + $0xc0] ss:$8 sps:$4 sm:$0xff]   ;;  %v1462_v54 = vld [vmem:[#allocation3 + $0xd4] ss:$8 sps:$4 sm:$0xff]   ;;  %v1460_v55 = vld [vmem:[#allocation3 + $0xd0] ss:$8 sps:$4 sm:$0xff]  }
  0x26   :  { %680 = vmatprep.subr.bf16.mxu0 %v1432_v18  ;;  %v1465_v56 = vld [vmem:[#allocation3 + $0xe4] ss:$8 sps:$4 sm:$0xff]   ;;  %v1463_v57 = vld [vmem:[#allocation3 + $0xe0] ss:$8 sps:$4 sm:$0xff]   ;;  %v1468_v58 = vld [vmem:[#allocation3 + $0xf4] ss:$8 sps:$4 sm:$0xff]  }
  0x27   :  { %1398 = vmatpush1.bf16.msra.mxu1 %v1430_v19  ;;  %v1466_v59 = vld [vmem:[#allocation3 + $0xf0] ss:$8 sps:$4 sm:$0xff]   ;;  %v70_v63 = vld [vmem:[%s2364_s2] sm:$0x3]  ;;  %vm1247_vm14 = vcmask 982912   ;;  %vm1254_vm15 = vcmask 1048512  }
  0x28   :  { %1383 = vmatprep.subr.bf16.mxu1 %v1435_v21  ;;  %v1921_v2 = vrot.slane %v70_v63, %v1915_v0 }
  0x29   :  { %681 = vmatpush1.bf16.msra.mxu0 %v1430_v19 }
  0x2a   :  { %682 = vmatprep.subr.bf16.mxu0 %v1435_v21 }
  0x2b   :  { %1399 = vmatpush1.bf16.msra.mxu1 %v1433_v24 }
  0x2c   :  { %1277 = vmatmul.mubr.msk.bf16.gmra.mrb[8].mxu0 %vm92_vm0, %v62_v20  ;;  %1384 = vmatprep.subr.bf16.mxu1 %v1438_v25 }
  0x2d   :  { %179 = vmatprep.mubr.bf16.mxu0 %v1776_v1  ;;  %683 = vmatpush1.bf16.msra.mxu0 %v1433_v24 }
  0x2e   :  { %684 = vmatprep.subr.bf16.mxu0 %v1438_v25 }
  0x2f   :  { %1400 = vmatpush1.bf16.msra.mxu1 %v1436_v27 }
  0x30   :  { %1385 = vmatprep.subr.bf16.mxu1 %v1441_v28 }
  0x31   :  { %685 = vmatpush1.bf16.msra.mxu0 %v1436_v27 }
  0x32   :  { %686 = vmatprep.subr.bf16.mxu0 %v1441_v28 }
  0x33   :  { %1401 = vmatpush1.bf16.msra.mxu1 %v1439_v31 }
  0x34   :  { %1278 = vmatmul.mubr.msk.bf16.gmra.mrb[12].mxu0 %vm92_vm0, %v63_v26  ;;  %1386 = vmatprep.subr.bf16.mxu1 %v1444_v42 }
  0x35   :  { %189 = vmatprep.mubr.bf16.mxu0 %v1776_v1  ;;  %687 = vmatpush1.bf16.msra.mxu0 %v1439_v31 }
  0x36   :  { %688 = vmatprep.subr.bf16.mxu0 %v1444_v42 }
  0x37   :  { %1402 = vmatpush1.bf16.msra.mxu1 %v1442_v43 }
  0x38   :  { %1387 = vmatprep.subr.bf16.mxu1 %v1447_v44 }
  0x39   :  { %689 = vmatpush1.bf16.msra.mxu0 %v1442_v43 }
  0x3a   :  { %690 = vmatprep.subr.bf16.mxu0 %v1447_v44 }
  0x3b   :  { %1403 = vmatpush1.bf16.msra.mxu1 %v1445_v45 }
  0x3c   :  { %1279 = vmatmul.mubr.msk.bf16.gmra.mrb[16].mxu0 %vm92_vm0, %v64_v32  ;;  %1388 = vmatprep.subr.bf16.mxu1 %v1450_v46 }
  0x3d   :  { %199 = vmatprep.mubr.bf16.mxu0 %v1776_v1  ;;  %691 = vmatpush1.bf16.msra.mxu0 %v1445_v45 }
  0x3e   :  { %692 = vmatprep.subr.bf16.mxu0 %v1450_v46 }
  0x3f   :  { %1404 = vmatpush1.bf16.msra.mxu1 %v1448_v47 }
  0x40   :  { %1389 = vmatprep.subr.bf16.mxu1 %v1453_v48 }
  0x41   :  { %693 = vmatpush1.bf16.msra.mxu0 %v1448_v47 }
  0x42   :  { %694 = vmatprep.subr.bf16.mxu0 %v1453_v48 }
  0x43   :  { %1405 = vmatpush1.bf16.msra.mxu1 %v1451_v49 }
  0x44   :  { %1280 = vmatmul.mubr.msk.bf16.gmra.mrb[20].mxu0 %vm92_vm0, %v65_v35  ;;  %1390 = vmatprep.subr.bf16.mxu1 %v1456_v50 }
  0x45   :  { %209 = vmatprep.mubr.bf16.mxu0 %v1776_v1  ;;  %695 = vmatpush1.bf16.msra.mxu0 %v1451_v49 }
  0x46   :  { %696 = vmatprep.subr.bf16.mxu0 %v1456_v50 }
  0x47   :  { %1406 = vmatpush1.bf16.msra.mxu1 %v1454_v51 }
  0x48   :  { %1391 = vmatprep.subr.bf16.mxu1 %v1459_v52 }
  0x49   :  { %697 = vmatpush1.bf16.msra.mxu0 %v1454_v51 }
  0x4a   :  { %698 = vmatprep.subr.bf16.mxu0 %v1459_v52 }
  0x4b   :  { %1407 = vmatpush1.bf16.msra.mxu1 %v1457_v53 }
  0x4c   :  { %1281 = vmatmul.mubr.msk.bf16.gmra.mrb[24].mxu0 %vm92_vm0, %v66_v38  ;;  %1392 = vmatprep.subr.bf16.mxu1 %v1462_v54 }
  0x4d   :  { %219 = vmatprep.mubr.bf16.mxu0 %v1776_v1  ;;  %699 = vmatpush1.bf16.msra.mxu0 %v1457_v53  ;;  %v1918_v1 = vrot.slane %v70_v63, %v1909_v62 }
  0x4e   :  { %700 = vmatprep.subr.bf16.mxu0 %v1462_v54 }
  0x4f   :  { %1408 = vmatpush1.bf16.msra.mxu1 %v1460_v55 }
  0x50   :  { %1393 = vmatprep.subr.bf16.mxu1 %v1465_v56 }
  0x51   :  { %701 = vmatpush1.bf16.msra.mxu0 %v1460_v55 }
  0x52   :  { %702 = vmatprep.subr.bf16.mxu0 %v1465_v56 }
  0x53   :  { %1409 = vmatpush1.bf16.msra.mxu1 %v1463_v57 }
  0x54   :  { %1282 = vmatmul.mubr.msk.bf16.gmra.mrb[28].mxu0 %vm92_vm0, %v67_v41  ;;  %1394 = vmatprep.subr.bf16.mxu1 %v1468_v58 }
  0x55   :  { %703 = vmatpush1.bf16.msra.mxu0 %v1463_v57 }
  0x56   :  { %704 = vmatprep.subr.bf16.mxu0 %v1468_v58 }
  0x57   :  { %1410 = vmatpush1.bf16.msra.mxu1 %v1466_v59 }
  0x59   :  { %705 = vmatpush1.bf16.msra.mxu0 %v1466_v59 }
  0xef   :  { %v151_v3 = vpop.f32.mrb[0].mxu0 }
  0xf0   :  { %v1924_v4 = vadd.f32 %v151_v3, %v1918_v1  ;;  %v153_v5 = vpop.f32.mrb[1].mxu0 }
  0xf1   :  { %v1927_v6 = vadd.f32 %v153_v5, %v1921_v2  ;;  %v155_v7 = vpop.f32.mrb[2].mxu0 }
  0xf2   :  { %v1283_v8 = vmul.f32 -1.442695, %v1924_v4  ;;  %v1931_v9 = vadd.f32 %v155_v7, %v1918_v1  ;;  %v157_v10 = vpop.f32.mrb[3].mxu0 }
  0xf3   :  { %v1284_v11 = vmul.f32 -1.442695, %v1927_v6  ;;  %v1935_v12 = vadd.f32 %v157_v10, %v1921_v2 }
  0xf4   :  { %1469 = vpow2.f32 %v1283_v8  ;;  %v1285_v13 = vmul.f32 -1.442695, %v1931_v9 }
  0xf5   :  { %1471 = vpow2.f32 %v1284_v11  ;;  %v1286_v14 = vmul.f32 -1.442695, %v1935_v12 }
  0xf6   :  { %1473 = vpow2.f32 %v1285_v13 }
  0xf7   :  { %1475 = vpow2.f32 %v1286_v14  ;;  %v161_v15 = vpop.f32.mrb[4].mxu0 }
  0xf8   :  { %v1940_v16 = vadd.f32 %v161_v15, %v1918_v1  ;;  %v163_v17 = vpop.f32.mrb[5].mxu0 }
  0xf9   :  { %v1943_v18 = vadd.f32 %v163_v17, %v1921_v2  ;;  %v165_v19 = vpop.f32.mrb[6].mxu0 }
  0xfa   :  { %v1287_v20 = vmul.f32 -1.442695, %v1940_v16  ;;  %v1947_v21 = vadd.f32 %v165_v19, %v1918_v1  ;;  %v167_v22 = vpop.f32.mrb[7].mxu0 }
  0xfb   :  { %v1288_v23 = vmul.f32 -1.442695, %v1943_v18  ;;  %v1951_v24 = vadd.f32 %v167_v22, %v1921_v2 }
  0xfc   :  { %1477 = vpow2.f32 %v1287_v20  ;;  %v1289_v25 = vmul.f32 -1.442695, %v1947_v21 }
  0xfd   :  { %1479 = vpow2.f32 %v1288_v23  ;;  %v1290_v26 = vmul.f32 -1.442695, %v1951_v24 }
  0xfe   :  { %v1470_v27 = vpop.eup %1469  ;;  %1481 = vpow2.f32 %v1289_v25 }
  0xff   :  { %v1472_v28 = vpop.eup %1471  ;;  %v326_v29 = vadd.f32 1.0, %v1470_v27  ;;  %1483 = vpow2.f32 %v1290_v26  ;;  %v171_v30 = vpop.f32.mrb[8].mxu0 }
 0x100   :  { %v1474_v31 = vpop.eup %1473  ;;  %v327_v32 = vadd.f32 1.0, %v1472_v28  ;;  %v1956_v33 = vadd.f32 %v171_v30, %v1918_v1  ;;  %v173_v34 = vpop.f32.mrb[9].mxu0 }
 0x101   :  { %v1476_v35 = vpop.eup %1475  ;;  %1485 = vrcp.f32 %v326_v29  ;;  %v328_v36 = vadd.f32 1.0, %v1474_v31  ;;  %v1959_v37 = vadd.f32 %v173_v34, %v1921_v2  ;;  %v175_v38 = vpop.f32.mrb[10].mxu0 }
 0x102   :  { %1487 = vrcp.f32 %v327_v32  ;;  %v329_v39 = vadd.f32 1.0, %v1476_v35  ;;  %v1291_v40 = vmul.f32 -1.442695, %v1956_v33  ;;  %v1963_v41 = vadd.f32 %v175_v38, %v1918_v1  ;;  %v177_v42 = vpop.f32.mrb[11].mxu0 }
 0x103   :  { %1489 = vrcp.f32 %v328_v36  ;;  %v1292_v43 = vmul.f32 -1.442695, %v1959_v37  ;;  %v1967_v44 = vadd.f32 %v177_v42, %v1921_v2 }
 0x104   :  { %1491 = vrcp.f32 %v329_v39  ;;  %v1293_v45 = vmul.f32 -1.442695, %v1963_v41 }
 0x105   :  { %1493 = vpow2.f32 %v1291_v40  ;;  %v1294_v46 = vmul.f32 -1.442695, %v1967_v44 }
 0x106   :  { %v1478_v47 = vpop.eup %1477  ;;  %1495 = vpow2.f32 %v1292_v43 }
 0x107   :  { %v1480_v48 = vpop.eup %1479  ;;  %v330_v49 = vadd.f32 1.0, %v1478_v47  ;;  %1497 = vpow2.f32 %v1293_v45  ;;  %v181_v50 = vpop.f32.mrb[12].mxu0 }
 0x108   :  { %v1482_v51 = vpop.eup %1481  ;;  %v331_v52 = vadd.f32 1.0, %v1480_v48  ;;  %1499 = vpow2.f32 %v1294_v46  ;;  %v1972_v53 = vadd.f32 %v181_v50, %v1918_v1  ;;  %v183_v54 = vpop.f32.mrb[13].mxu0 }
 0x109   :  { %v1484_v55 = vpop.eup %1483  ;;  %1501 = vrcp.f32 %v330_v49  ;;  %v332_v56 = vadd.f32 1.0, %v1482_v51  ;;  %v1975_v57 = vadd.f32 %v183_v54, %v1921_v2  ;;  %v185_v58 = vpop.f32.mrb[14].mxu0 }
 0x10a   :  { %1503 = vrcp.f32 %v331_v52  ;;  %v333_v59 = vadd.f32 1.0, %v1484_v55  ;;  %v1295_v63 = vmul.f32 -1.442695, %v1972_v53  ;;  %v1979_v3 = vadd.f32 %v185_v58, %v1918_v1  ;;  %v187_v5 = vpop.f32.mrb[15].mxu0 }
 0x10b   :  { %v1486_v7 = vpop.eup %1485  ;;  %1505 = vrcp.f32 %v332_v56  ;;  %v1296_v8 = vmul.f32 -1.442695, %v1975_v57  ;;  %v1983_v10 = vadd.f32 %v187_v5, %v1921_v2 }
 0x10c   :  { %v1488_v11 = vpop.eup %1487  ;;  %1507 = vrcp.f32 %v333_v59  ;;  %v1297_v13 = vmul.f32 -1.442695, %v1979_v3  ;;  %v422_v19 = vmul.f32 %v1486_v7, %v1924_v4 }
 0x10d   :  { %v1490_v14 = vpop.eup %1489  ;;  %1509 = vpow2.f32 %v1295_v63  ;;  %v1298_v15 = vmul.f32 -1.442695, %v1983_v10  ;;  %v423_v23 = vmul.f32 %v1488_v11, %v1927_v6 }
 0x10e   :  { %v1492_v17 = vpop.eup %1491  ;;  %v424_v20 = vmul.f32 %v1490_v14, %v1931_v9  ;;  %1511 = vpow2.f32 %v1296_v8 }
 0x10f   :  { %v1494_v22 = vpop.eup %1493  ;;  %v425_v25 = vmul.f32 %v1492_v17, %v1935_v12  ;;  %1513 = vpow2.f32 %v1297_v13  ;;  %v191_v26 = vpop.f32.mrb[16].mxu0 }
 0x110   :  { %v1496_v27 = vpop.eup %1495  ;;  %v454_v28 = vpack.c.bf16 %v424_v20, %v422_v19  ;;  %v334_v29 = vadd.f32 1.0, %v1494_v22  ;;  %1515 = vpow2.f32 %v1298_v15  ;;  %v1992_v30 = vadd.f32 %v191_v26, %v1918_v1  ;;  %v193_v31 = vpop.f32.mrb[17].mxu0 }
 0x111   :  { %v1498_v32 = vpop.eup %1497  ;;  %v335_v4 = vadd.f32 1.0, %v1496_v27  ;;  %v1995_v9 = vadd.f32 %v193_v31, %v1921_v2  ;;  %v195_v34 = vpop.f32.mrb[18].mxu0  ;;  %v455_v35 = vpack.c.bf16 %v425_v25, %v423_v23 }
 0x112   :  { %v1500_v6 = vpop.eup %1499  ;;  %1517 = vrcp.f32 %v334_v29  ;;  %v336_v12 = vadd.f32 1.0, %v1498_v32  ;;  %v1299_v36 = vmul.f32 -1.442695, %v1992_v30  ;;  %v1999_v38 = vadd.f32 %v195_v34, %v1918_v1  ;;  %v197_v39 = vpop.f32.mrb[19].mxu0 }
 0x113   :  { %v1502_v40 = vpop.eup %1501  ;;  %1519 = vrcp.f32 %v335_v4  ;;  %v337_v42 = vadd.f32 1.0, %v1500_v6  ;;  %v1300_v43 = vmul.f32 -1.442695, %v1995_v9  ;;  %v2003_v45 = vadd.f32 %v197_v39, %v1921_v2  ;;  %706 = vmatprep.mubr.bf16.mxu0 %v455_v35 }
 0x114   :  { %v1504_v46 = vpop.eup %1503  ;;  %1521 = vrcp.f32 %v336_v12  ;;  %v1301_v47 = vmul.f32 -1.442695, %v1999_v38  ;;  %707 = vmatmul.mubr.bf16.vlgmr.msra.gmra.mrb[32].mxu0 %v454_v28  ;;  %v426_v51 = vmul.f32 %v1502_v40, %v1940_v16 }
 0x115   :  { %v1506_v48 = vpop.eup %1505  ;;  %1523 = vrcp.f32 %v337_v42  ;;  %v1302_v49 = vmul.f32 -1.442695, %v2003_v45  ;;  %v427_v55 = vmul.f32 %v1504_v46, %v1943_v18 }
 0x116   :  { %v1508_v50 = vpop.eup %1507  ;;  %v428_v52 = vmul.f32 %v1506_v48, %v1947_v21  ;;  %1525 = vpow2.f32 %v1299_v36 }
 0x117   :  { %v1510_v54 = vpop.eup %1509  ;;  %v429_v56 = vmul.f32 %v1508_v50, %v1951_v24  ;;  %1527 = vpow2.f32 %v1300_v43  ;;  %v201_v58 = vpop.f32.mrb[20].mxu0 }
 0x118   :  { %v1512_v59 = vpop.eup %1511  ;;  %v338_v63 = vadd.f32 1.0, %v1510_v54  ;;  %1529 = vpow2.f32 %v1301_v47  ;;  %v2012_v5 = vadd.f32 %v201_v58, %v1918_v1  ;;  %v203_v7 = vpop.f32.mrb[21].mxu0  ;;  %v456_v8 = vpack.c.bf16 %v428_v52, %v426_v51 }
 0x119   :  { %v1514_v11 = vpop.eup %1513  ;;  %v339_v16 = vadd.f32 1.0, %v1512_v59  ;;  %1531 = vpow2.f32 %v1302_v49  ;;  %v2015_v21 = vadd.f32 %v203_v7, %v1921_v2  ;;  %v205_v13 = vpop.f32.mrb[22].mxu0  ;;  %v457_v18 = vpack.c.bf16 %v429_v56, %v427_v55 }
 0x11a   :  { %v1516_v14 = vpop.eup %1515  ;;  %1533 = vrcp.f32 %v338_v63  ;;  %v340_v24 = vadd.f32 1.0, %v1514_v11  ;;  %v1303_v15 = vmul.f32 -1.442695, %v2012_v5  ;;  %v2019_v17 = vadd.f32 %v205_v13, %v1918_v1  ;;  %v207_v19 = vpop.f32.mrb[23].mxu0 }
 0x11b   :  { %1535 = vrcp.f32 %v339_v16  ;;  %v341_v20 = vadd.f32 1.0, %v1516_v14  ;;  %v1304_v22 = vmul.f32 -1.442695, %v2015_v21  ;;  %v2023_v23 = vadd.f32 %v207_v19, %v1921_v2  ;;  %716 = vmatprep.mubr.bf16.mxu0 %v457_v18 }
 0x11c   :  { %v1518_v25 = vpop.eup %1517  ;;  %1537 = vrcp.f32 %v340_v24  ;;  %v1305_v26 = vmul.f32 -1.442695, %v2019_v17  ;;  %717 = vmatmul.mubr.bf16.gmra.mrb[36].mxu0 %v456_v8 }
 0x11d   :  { %v1520_v27 = vpop.eup %1519  ;;  %1539 = vrcp.f32 %v341_v20  ;;  %v1306_v28 = vmul.f32 -1.442695, %v2023_v23  ;;  %v430_v32 = vmul.f32 %v1518_v25, %v1956_v33 }
 0x11e   :  { %v1522_v29 = vpop.eup %1521  ;;  %1541 = vpow2.f32 %v1303_v15  ;;  %v431_v6 = vmul.f32 %v1520_v27, %v1959_v37 }
 0x11f   :  { %v1524_v31 = vpop.eup %1523  ;;  %v432_v4 = vmul.f32 %v1522_v29, %v1963_v41  ;;  %1543 = vpow2.f32 %v1304_v22  ;;  %v211_v34 = vpop.f32.mrb[24].mxu0 }
 0x120   :  { %v1526_v35 = vpop.eup %1525  ;;  %v433_v12 = vmul.f32 %v1524_v31, %v1967_v44  ;;  %1545 = vpow2.f32 %v1305_v26  ;;  %v2032_v36 = vadd.f32 %v211_v34, %v1918_v1  ;;  %v213_v39 = vpop.f32.mrb[25].mxu0 }
 0x121   :  { %v1528_v40 = vpop.eup %1527  ;;  %v342_v42 = vadd.f32 1.0, %v1526_v35  ;;  %1547 = vpow2.f32 %v1306_v28  ;;  %v2035_v43 = vadd.f32 %v213_v39, %v1921_v2  ;;  %v215_v33 = vpop.f32.mrb[26].mxu0  ;;  %v458_v41 = vpack.c.bf16 %v432_v4, %v430_v32 }
 0x122   :  { %v1530_v46 = vpop.eup %1529  ;;  %v343_v47 = vadd.f32 1.0, %v1528_v40  ;;  %v2038_v48 = vadd.f32 %v215_v33, %v1918_v1  ;;  %v217_v37 = vpop.f32.mrb[27].mxu0  ;;  %v459_v44 = vpack.c.bf16 %v433_v12, %v431_v6  ;;  %v1307_v51 = vmul.f32 -1.442695, %v2032_v36 }
 0x123   :  { %v1532_v49 = vpop.eup %1531  ;;  %1549 = vrcp.f32 %v342_v42  ;;  %v344_v50 = vadd.f32 1.0, %v1530_v46  ;;  %v2042_v52 = vadd.f32 %v217_v37, %v1921_v2  ;;  %v1308_v56 = vmul.f32 -1.442695, %v2035_v43 }
 0x124   :  { %v1534_v54 = vpop.eup %1533  ;;  %1551 = vrcp.f32 %v343_v47  ;;  %v345_v55 = vadd.f32 1.0, %v1532_v49  ;;  %726 = vmatprep.mubr.bf16.mxu0 %v459_v44  ;;  %v1309_v59 = vmul.f32 -1.442695, %v2038_v48 }
 0x125   :  { %v1536_v58 = vpop.eup %1535  ;;  %1553 = vrcp.f32 %v344_v50  ;;  %727 = vmatmul.mubr.bf16.gmra.mrb[40].mxu0 %v458_v41  ;;  %v1310_v7 = vmul.f32 -1.442695, %v2042_v52  ;;  %v434_v11 = vmul.f32 %v1534_v54, %v1972_v53 }
 0x126   :  { %v1538_v63 = vpop.eup %1537  ;;  %1555 = vrcp.f32 %v345_v55  ;;  %v435_v29 = vmul.f32 %v1536_v58, %v1975_v57 }
 0x127   :  { %v1540_v8 = vpop.eup %1539  ;;  %v436_v16 = vmul.f32 %v1538_v63, %v1979_v3  ;;  %1557 = vpow2.f32 %v1307_v51  ;;  %v221_v13 = vpop.f32.mrb[28].mxu0 }
 0x128   :  { %v1542_v18 = vpop.eup %1541  ;;  %1559 = vpow2.f32 %v1308_v56  ;;  %v2050_v14 = vadd.f32 %v221_v13, %v1918_v1  ;;  %v223_v24 = vpop.f32.mrb[29].mxu0  ;;  %v437_v15 = vmul.f32 %v1540_v8, %v1983_v10 }
 0x129   :  { %v1544_v19 = vpop.eup %1543  ;;  %v346_v20 = vadd.f32 1.0, %v1542_v18  ;;  %1561 = vpow2.f32 %v1309_v59  ;;  %v2054_v22 = vadd.f32 %v223_v24, %v1921_v2  ;;  %v225_v25 = vpop.f32.mrb[30].mxu0  ;;  %v460_v53 = vpack.c.bf16 %v436_v16, %v434_v11 }
 0x12a   :  { %v1546_v26 = vpop.eup %1545  ;;  %v347_v3 = vadd.f32 1.0, %v1544_v19  ;;  %1563 = vpow2.f32 %v1310_v7  ;;  %v2057_v27 = vadd.f32 %v225_v25, %v1918_v1  ;;  %v227_v28 = vpop.f32.mrb[31].mxu0  ;;  %v1311_v32 = vmul.f32 -1.442695, %v2050_v14 }
 0x12b   :  { %v1548_v31 = vpop.eup %1547  ;;  %1565 = vrcp.f32 %v346_v20  ;;  %v348_v10 = vadd.f32 1.0, %v1546_v26  ;;  %v2062_v4 = vadd.f32 %v227_v28, %v1921_v2  ;;  %v1312_v35 = vmul.f32 -1.442695, %v2054_v22 }
 0x12c   :  { %1567 = vrcp.f32 %v347_v3  ;;  %v349_v34 = vadd.f32 1.0, %v1548_v31  ;;  %v461_v6 = vpack.c.bf16 %v437_v15, %v435_v29  ;;  %v1313_v1 = vmul.f32 -1.442695, %v2057_v27 }
 0x12d   :  { %v1550_v12 = vpop.eup %1549  ;;  %1569 = vrcp.f32 %v348_v10  ;;  %v1314_v57 = vmul.f32 -1.442695, %v2062_v4 }
 0x12e   :  { %v1552_v39 = vpop.eup %1551  ;;  %1571 = vrcp.f32 %v349_v34  ;;  %736 = vmatprep.mubr.bf16.mxu1 %v461_v6  ;;  %v438_v2 = vmul.f32 %v1550_v12, %v1992_v30 }
 0x12f   :  { %v1554_v40 = vpop.eup %1553  ;;  %1573 = vpow2.f32 %v1311_v32  ;;  %737 = vmatmul.mubr.bf16.vlgmr.msra.gmra.mrb[0].mxu1 %v460_v53  ;;  %v439_v46 = vmul.f32 %v1552_v39, %v1995_v9 }
 0x130   :  { %v1556_v42 = vpop.eup %1555  ;;  %v440_v33 = vmul.f32 %v1554_v40, %v1999_v38  ;;  %1575 = vpow2.f32 %v1312_v35 }
 0x131   :  { %v1558_v41 = vpop.eup %1557  ;;  %v441_v47 = vmul.f32 %v1556_v42, %v2003_v45  ;;  %1577 = vpow2.f32 %v1313_v1 }
 0x132   :  { %v1560_v37 = vpop.eup %1559  ;;  %v350_v44 = vadd.f32 1.0, %v1558_v41  ;;  %1579 = vpow2.f32 %v1314_v57  ;;  %v462_v49 = vpack.c.bf16 %v440_v33, %v438_v2 }
 0x133   :  { %v1562_v50 = vpop.eup %1561  ;;  %v351_v51 = vadd.f32 1.0, %v1560_v37  ;;  %v463_v54 = vpack.c.bf16 %v441_v47, %v439_v46 }
 0x134   :  { %v1564_v55 = vpop.eup %1563  ;;  %1581 = vrcp.f32 %v350_v44  ;;  %v352_v56 = vadd.f32 1.0, %v1562_v50 }
 0x135   :  { %v1566_v30 = vpop.eup %1565  ;;  %1583 = vrcp.f32 %v351_v51  ;;  %v353_v38 = vadd.f32 1.0, %v1564_v55  ;;  %746 = vmatprep.mubr.bf16.mxu1 %v463_v54 }
 0x136   :  { %v1568_v58 = vpop.eup %1567  ;;  %1585 = vrcp.f32 %v352_v56  ;;  %v442_v59 = vmul.f32 %v1566_v30, %v2012_v5 }
 0x137   :  { %v1570_v9 = vpop.eup %1569  ;;  %1587 = vrcp.f32 %v353_v38  ;;  %747 = vmatmul.mubr.bf16.gmra.mrb[4].mxu1 %v462_v49  ;;  %v443_v8 = vmul.f32 %v1568_v58, %v2015_v21 }
 0x138   :  { %v1572_v45 = vpop.eup %1571  ;;  %v444_v63 = vmul.f32 %v1570_v9, %v2019_v17 }
 0x139   :  { %v1574_v7 = vpop.eup %1573  ;;  %v445_v11 = vmul.f32 %v1572_v45, %v2023_v23 }
 0x13a   :  { %v1576_v16 = vpop.eup %1575  ;;  %v354_v13 = vadd.f32 1.0, %v1574_v7  ;;  %v464_v18 = vpack.c.bf16 %v444_v63, %v442_v59 }
 0x13b   :  { %v1578_v24 = vpop.eup %1577  ;;  %v355_v15 = vadd.f32 1.0, %v1576_v16  ;;  %v465_v19 = vpack.c.bf16 %v445_v11, %v443_v8 }
 0x13c   :  { %v1580_v20 = vpop.eup %1579  ;;  %1589 = vrcp.f32 %v354_v13  ;;  %v356_v25 = vadd.f32 1.0, %v1578_v24 }
 0x13d   :  { %1591 = vrcp.f32 %v355_v15  ;;  %v357_v53 = vadd.f32 1.0, %v1580_v20  ;;  %756 = vmatprep.mubr.bf16.mxu1 %v465_v19 }
 0x13e   :  { %v1582_v5 = vpop.eup %1581  ;;  %1593 = vrcp.f32 %v356_v25 }
 0x13f   :  { %v1584_v17 = vpop.eup %1583  ;;  %1595 = vrcp.f32 %v357_v53  ;;  %757 = vmatmul.mubr.bf16.gmra.mrb[8].mxu1 %v464_v18  ;;  %v446_v23 = vmul.f32 %v1582_v5, %v2032_v36 }
 0x140   :  { %v1586_v21 = vpop.eup %1585  ;;  %v447_v28 = vmul.f32 %v1584_v17, %v2035_v43 }
 0x141   :  { %v1588_v26 = vpop.eup %1587  ;;  %v448_v3 = vmul.f32 %v1586_v21, %v2038_v48 }
 0x142   :  { %v449_v29 = vmul.f32 %v1588_v26, %v2042_v52  ;;  %v502_v52 = vld [vmem:[%s2366_s4] sm:$0x3] }
 0x143   :  { %v466_v31 = vpack.c.bf16 %v448_v3, %v446_v23  ;;  %v2087_v57 = vrot.slane %v502_v52, %v1909_v62  ;;  %v2090_v40 = vrot.slane %v502_v52, %v1915_v0 }
 0x144   :  { %v467_v10 = vpack.c.bf16 %v449_v29, %v447_v28 }
 0x146   :  { %v1590_v32 = vpop.eup %1589  ;;  %766 = vmatprep.mubr.bf16.mxu1 %v467_v10 }
 0x147   :  { %v1592_v34 = vpop.eup %1591  ;;  %767 = vmatmul.mubr.bf16.gmra.mrb[12].mxu1 %v466_v31  ;;  %v450_v12 = vmul.f32 %v1590_v32, %v2050_v14  ;;  %v1011_v32 = vld [vmem:[%s2367_s5] sm:$0x3]  ;;  %s1777_s5 = smov [#allocation6]  }
 0x148   :  { %v1594_v35 = vpop.eup %1593  ;;  %v451_v36 = vmul.f32 %v1592_v34, %v2054_v22  ;;  %s1264_s27 = sshll.u32 %s1777_s5, 4  ;;  %s1265_s27 = int_to_ptr.vmem [resolvable:$true] %s1264_s27 }
 0x149   :  { %v1596_v6 = vpop.eup %1595  ;;  %v452_v1 = vmul.f32 %v1594_v35, %v2057_v27  ;;  %s1747_s28 = scalar_lea.vmem %s1265_s27, 16  ;;  %s1751_s29 = scalar_lea.vmem %s1265_s27, 32 }
 0x14a   :  { %v453_v48 = vmul.f32 %v1596_v6, %v2062_v4  ;;  %p1748_p8 = scmp.ne.s32.totalorder %s1265_s27, %s1747_s28  ;;  %p1752_p9 = scmp.lt.s32.totalorder %s1265_s27, %s1265_s27 }
 0x14b   :  { %v468_v39 = vpack.c.bf16 %v452_v1, %v450_v12  ;;  %p1753_p10 = scmp.lt.s32.totalorder %s1751_s29, %s1747_s28 }
 0x14c   :  { %v469_v43 = vpack.c.bf16 %v453_v48, %v451_v36  ;;  %v2144_v48 = vrot.slane %v1011_v32, %v1909_v62 }
 0x14d   :  { %p1754_p11 = por %p1753_p10, %p1752_p9 }
 0x14e   :  { %776 = vmatprep.mubr.bf16.mxu1 %v469_v43 }
 0x14f   :  { %777 = vmatmul.mubr.bf16.gmra.mrb[16].mxu1 %v468_v39  ;;  %p1755_p12 = pnand %p1754_p11, %p1748_p8 }
 0x1e7   :  { %v708_v14 = vpop.f32.mrb[32].mxu0 }
 0x1e8   :  { %v2093_v27 = vadd.f32 %v708_v14, %v2087_v57  ;;  %v710_v22 = vpop.f32.mrb[33].mxu0  ;;  %v2150_v14 = vrot.slane %v1011_v32, %v1915_v0 }
 0x1e9   :  { %v2096_v4 = vadd.f32 %v710_v22, %v2090_v40  ;;  %v712_v42 = vpop.f32.mrb[34].mxu0 }
 0x1ea   :  { %v1347_v2 = vmul.f32 -1.442695, %v2093_v27  ;;  %v2100_v33 = vadd.f32 %v712_v42, %v2087_v57  ;;  %v714_v41 = vpop.f32.mrb[35].mxu0 }
 0x1eb   :  { %v1348_v46 = vmul.f32 -1.442695, %v2096_v4  ;;  %v2104_v47 = vadd.f32 %v714_v41, %v2090_v40 }
 0x1ec   :  { %1597 = vpow2.f32 %v1347_v2  ;;  %v1349_v37 = vmul.f32 -1.442695, %v2100_v33 }
 0x1ed   :  { %1599 = vpow2.f32 %v1348_v46  ;;  %v1350_v44 = vmul.f32 -1.442695, %v2104_v47 }
 0x1ee   :  { %1601 = vpow2.f32 %v1349_v37 }
 0x1ef   :  { %1603 = vpow2.f32 %v1350_v44  ;;  %v718_v49 = vpop.f32.mrb[36].mxu0 }
 0x1f0   :  { %v2109_v50 = vadd.f32 %v718_v49, %v2087_v57  ;;  %v720_v51 = vpop.f32.mrb[37].mxu0 }
 0x1f1   :  { %v2112_v54 = vadd.f32 %v720_v51, %v2090_v40  ;;  %v722_v55 = vpop.f32.mrb[38].mxu0 }
 0x1f2   :  { %v1351_v56 = vmul.f32 -1.442695, %v2109_v50  ;;  %v2116_v30 = vadd.f32 %v722_v55, %v2087_v57  ;;  %v724_v38 = vpop.f32.mrb[39].mxu0 }
 0x1f3   :  { %v1352_v58 = vmul.f32 -1.442695, %v2112_v54  ;;  %v2120_v9 = vadd.f32 %v724_v38, %v2090_v40 }
 0x1f4   :  { %1605 = vpow2.f32 %v1351_v56  ;;  %v1353_v45 = vmul.f32 -1.442695, %v2116_v30 }
 0x1f5   :  { %1607 = vpow2.f32 %v1352_v58  ;;  %v1354_v59 = vmul.f32 -1.442695, %v2120_v9 }
 0x1f6   :  { %v1598_v63 = vpop.eup %1597  ;;  %1609 = vpow2.f32 %v1353_v45 }
 0x1f7   :  { %v1600_v7 = vpop.eup %1599  ;;  %v883_v8 = vadd.f32 1.0, %v1598_v63  ;;  %1611 = vpow2.f32 %v1354_v59 }
 0x1f8   :  { %v1602_v11 = vpop.eup %1601  ;;  %v884_v16 = vadd.f32 1.0, %v1600_v7  ;;  %v728_v13 = vpop.f32.mrb[40].mxu0 }
 0x1f9   :  { %v1604_v18 = vpop.eup %1603  ;;  %1613 = vrcp.f32 %v883_v8  ;;  %v885_v24 = vadd.f32 1.0, %v1602_v11  ;;  %v2125_v15 = vadd.f32 %v728_v13, %v2087_v57  ;;  %v730_v19 = vpop.f32.mrb[41].mxu0 }
 0x1fa   :  { %1615 = vrcp.f32 %v884_v16  ;;  %v886_v20 = vadd.f32 1.0, %v1604_v18  ;;  %v2128_v25 = vadd.f32 %v730_v19, %v2090_v40  ;;  %v732_v53 = vpop.f32.mrb[42].mxu0 }
 0x1fb   :  { %1617 = vrcp.f32 %v885_v24  ;;  %v1355_v5 = vmul.f32 -1.442695, %v2125_v15  ;;  %v2132_v17 = vadd.f32 %v732_v53, %v2087_v57  ;;  %v734_v21 = vpop.f32.mrb[43].mxu0 }
 0x1fc   :  { %1619 = vrcp.f32 %v886_v20  ;;  %v1356_v26 = vmul.f32 -1.442695, %v2128_v25  ;;  %v2136_v23 = vadd.f32 %v734_v21, %v2090_v40 }
 0x1fd   :  { %1621 = vpow2.f32 %v1355_v5  ;;  %v1357_v3 = vmul.f32 -1.442695, %v2132_v17 }
 0x1fe   :  { %v1606_v28 = vpop.eup %1605  ;;  %1623 = vpow2.f32 %v1356_v26  ;;  %v1358_v29 = vmul.f32 -1.442695, %v2136_v23 }
 0x1ff   :  { %v1608_v31 = vpop.eup %1607  ;;  %v887_v10 = vadd.f32 1.0, %v1606_v28  ;;  %1625 = vpow2.f32 %v1357_v3 }
 0x200   :  { %v1610_v34 = vpop.eup %1609  ;;  %v888_v35 = vadd.f32 1.0, %v1608_v31  ;;  %1627 = vpow2.f32 %v1358_v29 }
 0x201   :  { %v1612_v6 = vpop.eup %1611  ;;  %1629 = vrcp.f32 %v887_v10  ;;  %v889_v12 = vadd.f32 1.0, %v1610_v34 }
 0x202   :  { %1631 = vrcp.f32 %v888_v35  ;;  %v890_v1 = vadd.f32 1.0, %v1612_v6  ;;  %v738_v36 = vpop.f32.mrb[0].mxu1 }
 0x203   :  { %v1614_v39 = vpop.eup %1613  ;;  %1633 = vrcp.f32 %v889_v12  ;;  %v2147_v43 = vadd.f32 %v738_v36, %v2087_v57  ;;  %v740_v52 = vpop.f32.mrb[1].mxu1 }
 0x204   :  { %v1616_v22 = vpop.eup %1615  ;;  %v979_v42 = vmul.f32 %v1614_v39, %v2093_v27  ;;  %1635 = vrcp.f32 %v890_v1  ;;  %v2154_v2 = vadd.f32 %v740_v52, %v2090_v40  ;;  %v742_v41 = vpop.f32.mrb[2].mxu1 }
 0x205   :  { %v1618_v46 = vpop.eup %1617  ;;  %v980_v37 = vmul.f32 %v1616_v22, %v2096_v4  ;;  %v1359_v44 = vmul.f32 -1.442695, %v2147_v43  ;;  %v2159_v49 = vadd.f32 %v742_v41, %v2087_v57  ;;  %v744_v51 = vpop.f32.mrb[3].mxu1 }
 0x206   :  { %v1620_v55 = vpop.eup %1619  ;;  %v981_v0 = vmul.f32 %v1618_v46, %v2100_v33  ;;  %v1360_v56 = vmul.f32 -1.442695, %v2154_v2  ;;  %v2164_v27 = vadd.f32 %v744_v51, %v2090_v40  ;;  %v1023_v38 = vmul.f32 %v2144_v48, %v979_v42 }
 0x207   :  { %v1622_v58 = vpop.eup %1621  ;;  %v982_v45 = vmul.f32 %v1620_v55, %v2104_v47  ;;  %1637 = vpow2.f32 %v1359_v44  ;;  %v1361_v4 = vmul.f32 -1.442695, %v2159_v49  ;;  %v1024_v59 = vmul.f32 %v2150_v14, %v980_v37 }
 0x208   :  { %v1624_v63 = vpop.eup %1623  ;;  %v891_v7 = vadd.f32 1.0, %v1622_v58  ;;  %1639 = vpow2.f32 %v1360_v56  ;;  %v1025_v33 = vmul.f32 %v2144_v48, %v981_v0  ;;  %v1362_v47 = vmul.f32 -1.442695, %v2164_v27 }
 0x209   :  { %v1626_v8 = vpop.eup %1625  ;;  %v892_v11 = vadd.f32 1.0, %v1624_v63  ;;  %1641 = vpow2.f32 %v1361_v4  ;;  %v1055_v16 = vadd.f32 %v1024_v59, %v1023_v38  ;;  %v1026_v13 = vmul.f32 %v2150_v14, %v982_v45 }
 0x20a   :  { %v1628_v18 = vpop.eup %1627  ;;  %1643 = vrcp.f32 %v891_v7  ;;  %v893_v24 = vadd.f32 1.0, %v1626_v8  ;;  %v748_v19 = vpop.f32.mrb[4].mxu1 }
 0x20b   :  { %v1630_v20 = vpop.eup %1629  ;;  %1645 = vrcp.f32 %v892_v11  ;;  %v894_v53 = vadd.f32 1.0, %v1628_v18  ;;  %v2174_v5 = vadd.f32 %v748_v19, %v2087_v57  ;;  %v750_v21 = vpop.f32.mrb[5].mxu1  ;;  %1056 = vadd.xlane.f32.xlu0 %v1055_v16  ;;  %v1058_v26 = vadd.f32 %v1026_v13, %v1025_v33 }
 0x20c   :  { %v1632_v3 = vpop.eup %1631  ;;  %v983_v28 = vmul.f32 %v1630_v20, %v2109_v50  ;;  %1647 = vrcp.f32 %v893_v24  ;;  %v2178_v29 = vadd.f32 %v750_v21, %v2090_v40  ;;  %v752_v31 = vpop.f32.mrb[6].mxu1 }
 0x20d   :  { %v1634_v10 = vpop.eup %1633  ;;  %v984_v32 = vmul.f32 %v1632_v3, %v2112_v54  ;;  %1649 = vrcp.f32 %v894_v53  ;;  %v1363_v34 = vmul.f32 -1.442695, %v2174_v5  ;;  %v2183_v35 = vadd.f32 %v752_v31, %v2087_v57  ;;  %v754_v6 = vpop.f32.mrb[7].mxu1 }
 0x20e   :  { %v1636_v12 = vpop.eup %1635  ;;  %v985_v1 = vmul.f32 %v1634_v10, %v2116_v30  ;;  %1651 = vpow2.f32 %v1362_v47  ;;  %v1364_v50 = vmul.f32 -1.442695, %v2178_v29  ;;  %v2188_v36 = vadd.f32 %v754_v6, %v2090_v40 }
 0x20f   :  { %v986_v39 = vmul.f32 %v1636_v12, %v2120_v9  ;;  %1653 = vpow2.f32 %v1363_v34  ;;  %v1365_v54 = vmul.f32 -1.442695, %v2183_v35  ;;  %1059 = vadd.xlane.f32.xlu0 %v1058_v26  ;;  %v1027_v52 = vmul.f32 %v2144_v48, %v983_v28 }
 0x210   :  { %1655 = vpow2.f32 %v1364_v50  ;;  %v1366_v22 = vmul.f32 -1.442695, %v2188_v36  ;;  %v1028_v42 = vmul.f32 %v2150_v14, %v984_v32  ;;  %v1029_v30 = vmul.f32 %v2144_v48, %v985_v1 }
 0x211   :  { %v1638_v41 = vpop.eup %1637  ;;  %1657 = vpow2.f32 %v1365_v54  ;;  %v1030_v46 = vmul.f32 %v2150_v14, %v986_v39 }
 0x212   :  { %v1640_v37 = vpop.eup %1639  ;;  %v895_v44 = vadd.f32 1.0, %v1638_v41  ;;  %1659 = vpow2.f32 %v1366_v22  ;;  %v758_v9 = vpop.f32.mrb[8].mxu1  ;;  %v1061_v51 = vadd.f32 %v1028_v42, %v1027_v52 }
 0x213   :  { %v1642_v55 = vpop.eup %1641  ;;  %v896_v0 = vadd.f32 1.0, %v1640_v37  ;;  %v2198_v56 = vadd.f32 %v758_v9, %v2087_v57  ;;  %v760_v38 = vpop.f32.mrb[9].mxu1  ;;  %v1064_v58 = vadd.f32 %v1030_v46, %v1029_v30 }
 0x214   :  { %v1644_v45 = vpop.eup %1643  ;;  %1661 = vrcp.f32 %v895_v44  ;;  %v897_v4 = vadd.f32 1.0, %v1642_v55  ;;  %v2201_v59 = vadd.f32 %v760_v38, %v2090_v40  ;;  %v762_v63 = vpop.f32.mrb[10].mxu1  ;;  %1062 = vadd.xlane.f32.xlu1 %v1061_v51 }
 0x215   :  { %v1646_v7 = vpop.eup %1645  ;;  %v987_v33 = vmul.f32 %v1644_v45, %v2125_v15  ;;  %1663 = vrcp.f32 %v896_v0  ;;  %v1367_v8 = vmul.f32 -1.442695, %v2198_v56  ;;  %v2206_v11 = vadd.f32 %v762_v63, %v2087_v57  ;;  %v764_v16 = vpop.f32.mrb[11].mxu1 }
 0x216   :  { %v1648_v13 = vpop.eup %1647  ;;  %v988_v18 = vmul.f32 %v1646_v7, %v2128_v25  ;;  %1665 = vrcp.f32 %v897_v4  ;;  %v1368_v24 = vmul.f32 -1.442695, %v2201_v59  ;;  %v2211_v47 = vadd.f32 %v764_v16, %v2090_v40 }
 0x217   :  { %v1650_v19 = vpop.eup %1649  ;;  %v989_v20 = vmul.f32 %v1648_v13, %v2132_v17  ;;  %1667 = vpow2.f32 %v1367_v8  ;;  %v1369_v15 = vmul.f32 -1.442695, %v2206_v11  ;;  %v1031_v53 = vmul.f32 %v2144_v48, %v987_v33 }
 0x218   :  { %v1652_v21 = vpop.eup %1651  ;;  %v990_v26 = vmul.f32 %v1650_v19, %v2136_v23  ;;  %1669 = vpow2.f32 %v1368_v24  ;;  %v1370_v25 = vmul.f32 -1.442695, %v2211_v47  ;;  %1065 = vadd.xlane.f32.xlu1 %v1064_v58  ;;  %v1032_v3 = vmul.f32 %v2150_v14, %v988_v18 }
 0x219   :  { %v1654_v28 = vpop.eup %1653  ;;  %v898_v31 = vadd.f32 1.0, %v1652_v21  ;;  %1671 = vpow2.f32 %v1369_v15  ;;  %v1033_v10 = vmul.f32 %v2144_v48, %v989_v20 }
 0x21a   :  { %v1656_v17 = vpop.eup %1655  ;;  %v899_v32 = vadd.f32 1.0, %v1654_v28  ;;  %1673 = vpow2.f32 %v1370_v25  ;;  %v768_v34 = vpop.f32.mrb[12].mxu1  ;;  %v1067_v6 = vadd.f32 %v1032_v3, %v1031_v53  ;;  %v1034_v12 = vmul.f32 %v2150_v14, %v990_v26 }
 0x21b   :  { %v1658_v1 = vpop.eup %1657  ;;  %1675 = vrcp.f32 %v898_v31  ;;  %v900_v23 = vadd.f32 1.0, %v1656_v17  ;;  %v2222_v50 = vadd.f32 %v768_v34, %v2087_v57  ;;  %v770_v39 = vpop.f32.mrb[13].mxu1 }
 0x21c   :  { %v1660_v54 = vpop.eup %1659  ;;  %1677 = vrcp.f32 %v899_v32  ;;  %v901_v52 = vadd.f32 1.0, %v1658_v1  ;;  %v2225_v22 = vadd.f32 %v770_v39, %v2090_v40  ;;  %v772_v42 = vpop.f32.mrb[14].mxu1  ;;  %1068 = vadd.xlane.f32.xlu0 %v1067_v6  ;;  %v1070_v30 = vadd.f32 %v1034_v12, %v1033_v10 }
 0x21d   :  { %1679 = vrcp.f32 %v900_v23  ;;  %v902_v41 = vadd.f32 1.0, %v1660_v54  ;;  %v1371_v46 = vmul.f32 -1.442695, %v2222_v50  ;;  %v2229_v37 = vadd.f32 %v772_v42, %v2087_v57  ;;  %v774_v44 = vpop.f32.mrb[15].mxu1 }
 0x21e   :  { %v1662_v9 = vpop.eup %1661  ;;  %1681 = vrcp.f32 %v901_v52  ;;  %v1372_v51 = vmul.f32 -1.442695, %v2225_v22  ;;  %v2233_v55 = vadd.f32 %v774_v44, %v2090_v40  ;;  %1071 = vadd.xlane.f32.xlu1 %v1070_v30 }
 0x21f   :  { %v1664_v0 = vpop.eup %1663  ;;  %v991_v38 = vmul.f32 %v1662_v9, %v2147_v43  ;;  %1683 = vrcp.f32 %v902_v41  ;;  %v1373_v58 = vmul.f32 -1.442695, %v2229_v37 }
 0x220   :  { %v1666_v45 = vpop.eup %1665  ;;  %v992_v4 = vmul.f32 %v1664_v0, %v2154_v2  ;;  %1685 = vpow2.f32 %v1371_v46  ;;  %v1374_v63 = vmul.f32 -1.442695, %v2233_v55 }
 0x221   :  { %v1668_v7 = vpop.eup %1667  ;;  %v993_v33 = vmul.f32 %v1666_v45, %v2159_v49  ;;  %1687 = vpow2.f32 %v1372_v51  ;;  %v1035_v8 = vmul.f32 %v2144_v48, %v991_v38 }
 0x222   :  { %v1670_v16 = vpop.eup %1669  ;;  %v903_v13 = vadd.f32 1.0, %v1668_v7  ;;  %1689 = vpow2.f32 %v1373_v58  ;;  %v778_v18 = vpop.f32.mrb[16].mxu1  ;;  %v1036_v43 = vmul.f32 %v2150_v14, %v992_v4 }
 0x223   :  { %v1672_v24 = vpop.eup %1671  ;;  %v904_v19 = vadd.f32 1.0, %v1670_v16  ;;  %1691 = vpow2.f32 %v1374_v63  ;;  %v2243_v2 = vadd.f32 %v778_v18, %v2087_v57  ;;  %v780_v20 = vpop.f32.mrb[17].mxu1  ;;  %v1037_v15 = vmul.f32 %v2144_v48, %v993_v33 }
 0x224   :  { %v1674_v53 = vpop.eup %1673  ;;  %1693 = vrcp.f32 %v903_v13  ;;  %v905_v49 = vadd.f32 1.0, %v1672_v24  ;;  %v2247_v21 = vadd.f32 %v780_v20, %v2090_v40  ;;  %v782_v26 = vpop.f32.mrb[18].mxu1  ;;  %v1073_v25 = vadd.f32 %v1036_v43, %v1035_v8 }
 0x225   :  { %v1676_v3 = vpop.eup %1675  ;;  %1695 = vrcp.f32 %v904_v19  ;;  %v906_v28 = vadd.f32 1.0, %v1674_v53  ;;  %v1375_v31 = vmul.f32 -1.442695, %v2243_v2  ;;  %v2251_v10 = vadd.f32 %v782_v26, %v2087_v57  ;;  %v784_v17 = vpop.f32.mrb[19].mxu1 }
 0x226   :  { %v1678_v32 = vpop.eup %1677  ;;  %v994_v34 = vmul.f32 %v1676_v3, %v2164_v27  ;;  %1697 = vrcp.f32 %v905_v49  ;;  %v1376_v6 = vmul.f32 -1.442695, %v2247_v21  ;;  %v2256_v12 = vadd.f32 %v784_v17, %v2090_v40  ;;  %1074 = vadd.xlane.f32.xlu0 %v1073_v25 }
 0x227   :  { %v1680_v1 = vpop.eup %1679  ;;  %v995_v23 = vmul.f32 %v1678_v32, %v2174_v5  ;;  %1699 = vrcp.f32 %v906_v28  ;;  %v1377_v39 = vmul.f32 -1.442695, %v2251_v10 }
 0x228   :  { %v1682_v54 = vpop.eup %1681  ;;  %v996_v57 = vmul.f32 %v1680_v1, %v2178_v29  ;;  %1701 = vpow2.f32 %v1375_v31  ;;  %v1378_v52 = vmul.f32 -1.442695, %v2256_v12  ;;  %v1038_v27 = vmul.f32 %v2150_v14, %v994_v34 }
 0x229   :  { %v1684_v42 = vpop.eup %1683  ;;  %v997_v30 = vmul.f32 %v1682_v54, %v2183_v35  ;;  %1703 = vpow2.f32 %v1376_v6  ;;  %v1039_v40 = vmul.f32 %v2144_v48, %v995_v23  ;;  %v1103_v35 = vld [vmem:[#allocation2] sm:$0x1] }
 0x22a   :  { %v1686_v41 = vpop.eup %1685  ;;  %v998_v5 = vmul.f32 %v1684_v42, %v2188_v36  ;;  %1705 = vpow2.f32 %v1377_v39  ;;  %v1076_v46 = vadd.f32 %v1038_v27, %v1037_v15  ;;  %v1040_v44 = vmul.f32 %v2150_v14, %v996_v57 }
 0x22b   :  { %v1688_v9 = vpop.eup %1687  ;;  %v907_v29 = vadd.f32 1.0, %v1686_v41  ;;  %1707 = vpow2.f32 %v1378_v52  ;;  %v1041_v51 = vmul.f32 %v2144_v48, %v997_v30 }
 0x22c   :  { %v1690_v0 = vpop.eup %1689  ;;  %v908_v38 = vadd.f32 1.0, %v1688_v9  ;;  %1077 = vadd.xlane.f32.xlu0 %v1076_v46  ;;  %v1079_v58 = vadd.f32 %v1040_v44, %v1039_v40  ;;  %v1042_v45 = vmul.f32 %v2150_v14, %v998_v5 }
 0x22d   :  { %v1692_v4 = vpop.eup %1691  ;;  %1709 = vrcp.f32 %v907_v29  ;;  %v909_v63 = vadd.f32 1.0, %v1690_v0 }
 0x22e   :  { %v1694_v36 = vpop.eup %1693  ;;  %1711 = vrcp.f32 %v908_v38  ;;  %v910_v7 = vadd.f32 1.0, %v1692_v4  ;;  %v1082_v33 = vadd.f32 %v1042_v45, %v1041_v51 }
 0x22f   :  { %v1696_v8 = vpop.eup %1695  ;;  %v999_v16 = vmul.f32 %v1694_v36, %v2198_v56  ;;  %1713 = vrcp.f32 %v909_v63  ;;  %1106 = vperm.xlu1 %1416, %v1103_v35  }
 0x230   :  { %v1698_v13 = vpop.eup %1697  ;;  %v1000_v18 = vmul.f32 %v1696_v8, %v2201_v59  ;;  %1715 = vrcp.f32 %v910_v7  ;;  %1080 = vadd.xlane.f32.xlu0 %v1079_v58  ;;  %v2294_v7 = vand.u32 127, %v72_v60 }
 0x231   :  { %v1700_v43 = vpop.eup %1699  ;;  %v1001_v24 = vmul.f32 %v1698_v13, %v2206_v11  ;;  %v1043_v19 = vmul.f32 %v2144_v48, %v999_v16 }
 0x232   :  { %v1702_v20 = vpop.eup %1701  ;;  %v1002_v15 = vmul.f32 %v1700_v43, %v2211_v47  ;;  %v1044_v53 = vmul.f32 %v2150_v14, %v1000_v18  ;;  %v1158_v16 = vadd.s32 4294967280, %v2294_v7 }
 0x233   :  { %v1704_v49 = vpop.eup %1703  ;;  %v911_v26 = vadd.f32 1.0, %v1702_v20  ;;  %v1045_v56 = vmul.f32 %v2144_v48, %v1001_v24  ;;  %v1149_v24 = vsub.s32 %v2294_v7, %v1906_v61 }
 0x234   :  { %v1706_v25 = vpop.eup %1705  ;;  %v912_v3 = vadd.f32 1.0, %v1704_v49  ;;  %1083 = vadd.xlane.f32.xlu0 %v1082_v33  ;;  %v1085_v59 = vadd.f32 %v1044_v53, %v1043_v19  ;;  %v1046_v28 = vmul.f32 %v2150_v14, %v1002_v15  ;;  %v1161_v20 = vsub.s32 %v1158_v16, %v1906_v61 }
 0x235   :  { %v1708_v31 = vpop.eup %1707  ;;  %1717 = vrcp.f32 %v911_v26  ;;  %v913_v11 = vadd.f32 1.0, %v1706_v25  ;;  %v1165_v53 = vadd.s32 4294967272, %v2294_v7 }
 0x236   :  { %1719 = vrcp.f32 %v912_v3  ;;  %v914_v17 = vadd.f32 1.0, %v1708_v31  ;;  %v1088_v32 = vadd.f32 %v1046_v28, %v1045_v56  ;;  %v1172_v56 = vadd.s32 4294967264, %v2294_v7 }
 0x237   :  { %v1710_v34 = vpop.eup %1709  ;;  %1721 = vrcp.f32 %v913_v11  ;;  %v1179_v31 = vadd.s32 4294967256, %v2294_v7 }
 0x238   :  { %v1712_v47 = vpop.eup %1711  ;;  %v1003_v6 = vmul.f32 %v1710_v34, %v2222_v50  ;;  %1723 = vrcp.f32 %v914_v17  ;;  %1086 = vadd.xlane.f32.xlu0 %v1085_v59  ;;  %v1168_v59 = vsub.s32 %v1165_v53, %v1906_v61 }
 0x239   :  { %v1714_v1 = vpop.eup %1713  ;;  %v1004_v23 = vmul.f32 %v1712_v47, %v2225_v22  ;;  %v1186_v47 = vadd.s32 4294967248, %v2294_v7 }
 0x23a   :  { %v1716_v39 = vpop.eup %1715  ;;  %v1005_v54 = vmul.f32 %v1714_v1, %v2229_v37  ;;  %v1047_v57 = vmul.f32 %v2144_v48, %v1003_v6 }
 0x23b   :  { %v1006_v52 = vmul.f32 %v1716_v39, %v2233_v55  ;;  %v1048_v27 = vmul.f32 %v2150_v14, %v1004_v23  ;;  %v1182_v23 = vsub.s32 %v1179_v31, %v1906_v61 }
 0x23c   :  { %v1049_v42 = vmul.f32 %v2144_v48, %v1005_v54 }
 0x23d   :  { %v1091_v30 = vadd.f32 %v1048_v27, %v1047_v57  ;;  %v1050_v40 = vmul.f32 %v2150_v14, %v1006_v52  ;;  %v1193_v57 = vadd.s32 4294967240, %v2294_v7  ;;  %v1189_v27 = vsub.s32 %v1186_v47, %v1906_v61 }
 0x23f   :  { %v1718_v50 = vpop.eup %1717  ;;  %1092 = vadd.xlane.f32.xlu0 %v1091_v30  ;;  %v1094_v41 = vadd.f32 %v1050_v40, %v1049_v42  ;;  %v1200_v30 = vadd.s32 4294967232, %v2294_v7 }
 0x240   :  { %v1720_v5 = vpop.eup %1719  ;;  %v1007_v22 = vmul.f32 %v1718_v50, %v2243_v2  ;;  %v1207_v50 = vadd.s32 4294967224, %v2294_v7 }
 0x241   :  { %v1722_v46 = vpop.eup %1721  ;;  %v1008_v37 = vmul.f32 %v1720_v5, %v2247_v21 }
 0x242   :  { %v1724_v44 = vpop.eup %1723  ;;  %v1009_v9 = vmul.f32 %v1722_v46, %v2251_v10  ;;  %v1051_v55 = vmul.f32 %v2144_v48, %v1007_v22  ;;  %v1196_v22 = vsub.s32 %v1193_v57, %v1906_v61 }
 0x243   :  { %v1010_v29 = vmul.f32 %v1724_v44, %v2256_v12  ;;  %1095 = vadd.xlane.f32.xlu0 %v1094_v41  ;;  %v1052_v51 = vmul.f32 %v2150_v14, %v1008_v37  ;;  %v1214_v41 = vadd.s32 4294967216, %v2294_v7  ;;  %v1203_v44 = vsub.s32 %v1200_v30, %v1906_v61 }
 0x244   :  { %v1053_v0 = vmul.f32 %v2144_v48, %v1009_v9 }
 0x245   :  { %v1097_v38 = vadd.f32 %v1052_v51, %v1051_v55  ;;  %v1054_v58 = vmul.f32 %v2150_v14, %v1010_v29  ;;  %v1151_v14 = vadd.s32 4294967288, %v2294_v7  ;;  %v1210_v29 = vsub.s32 %v1207_v50, %v1906_v61 }
 0x247   :  { %1098 = vadd.xlane.f32.xlu0 %v1097_v38  ;;  %v1100_v2 = vadd.f32 %v1054_v58, %v1053_v0  ;;  %v1154_v60 = vsub.s32 %v1151_v14, %v1906_v61  ;;  %v1221_v0 = vadd.s32 4294967208, %v2294_v7  ;;  %v1217_v58 = vsub.s32 %v1214_v41, %v1906_v61 }
 0x24b   :  { %1101 = vadd.xlane.f32.xlu0 %v1100_v2 }
 0x253   :  { %1089 = vadd.xlane.f32.xlu1 %v1088_v32  ;;  %v1175_v32 = vsub.s32 %v1172_v56, %v1906_v61 }
 0x298   :  { %v1057_v21 = vpop.xlane.xlu0 %1056 }
 0x29c   :  { %v1060_v35 = vpop.xlane.xlu0 %1059 }
 0x2a1   :  { %v1063_v45 = vpop.xlane.xlu1 %1062 }
 0x2a5   :  { %v1066_v63 = vpop.xlane.xlu1 %1065 }
 0x2a9   :  { %v1069_v10 = vpop.xlane.xlu0 %1068 }
 0x2ab   :  { %v1072_v36 = vpop.xlane.xlu1 %1071 }
 0x2af   :  { %v1107_v33 = vpop.permute.xlu1 %1106 }
 0x2b0   :  { %v2297_v8 = vrot.slane %v1107_v33, %v1909_v62  ;;  %v1224_v33 = vsub.s32 %v1221_v0, %v1906_v61 }
 0x2b2   :  { %v1113_v18 = vadd.f32 %v2297_v8, %v1057_v21  ;;  %v1114_v43 = vadd.f32 %v2297_v8, %v1060_v35  ;;  %v1115_v19 = vadd.f32 %v2297_v8, %v1063_v45  ;;  %v1116_v25 = vadd.f32 %v2297_v8, %v1066_v63 }
 0x2b3   :  { %v1075_v4 = vpop.xlane.xlu0 %1074  ;;  %v1117_v11 = vadd.f32 %v2297_v8, %v1069_v10  ;;  %v1118_v6 = vadd.f32 %v2297_v8, %v1072_v36  ;;  %v1228_v21 = vadd.s32 4294967200, %v2294_v7  ;;  %v1235_v45 = vadd.s32 4294967192, %v2294_v7 }
 0x2b4   :  { %v1150_v62 = vrot.slane %v1113_v18, %v1149_v24  ;;  %v1155_v15 = vrot.slane %v1114_v43, %v1154_v60  ;;  %v1162_v26 = vrot.slane %v1115_v19, %v1161_v20  ;;  %v1169_v34 = vrot.slane %v1116_v25, %v1168_v59 }
 0x2b5   :  { %v1176_v39 = vrot.slane %v1117_v11, %v1175_v32  ;;  %v1119_v42 = vadd.f32 %v2297_v8, %v1075_v4  ;;  %v1183_v40 = vrot.slane %v1118_v6, %v1182_v23  ;;  %v1242_v10 = vadd.s32 4294967184, %v2294_v7 }
 0x2b6   :  { %v1157_v3 = vsel %vm1156_vm1, %v1155_v15, %v1150_v62  ;;  %v1249_v63 = vadd.s32 4294967176, %v2294_v7  ;;  %v1231_v14 = vsub.s32 %v1228_v21, %v1906_v61  ;;  %v1238_v43 = vsub.s32 %v1235_v45, %v1906_v61 }
 0x2b7   :  { %v1164_v17 = vsel %vm1163_vm2, %v1162_v26, %v1157_v3  ;;  %v1190_v37 = vrot.slane %v1119_v42, %v1189_v27  ;;  %v1245_v60 = vsub.s32 %v1242_v10, %v1906_v61 }
 0x2b8   :  { %v1171_v1 = vsel %vm1170_vm3, %v1169_v34, %v1164_v17  ;;  %v1252_v62 = vsub.s32 %v1249_v63, %v1906_v61 }
 0x2b9   :  { %v1078_v12 = vpop.xlane.xlu0 %1077  ;;  %v1178_v52 = vsel %vm1177_vm4, %v1176_v39, %v1171_v1 }
 0x2ba   :  { %v1185_v5 = vsel %vm1184_vm5, %v1183_v40, %v1178_v52  ;;  %v1120_v46 = vadd.f32 %v2297_v8, %v1078_v12 }
 0x2bb   :  { %v1192_v38 = vsel %vm1191_vm6, %v1190_v37, %v1185_v5 }
 0x2bc   :  { %v1197_v35 = vrot.slane %v1120_v46, %v1196_v22 }
 0x2bd   :  { %v1081_v48 = vpop.xlane.xlu0 %1080 }
 0x2be   :  { %v1121_v9 = vadd.f32 %v2297_v8, %v1081_v48  ;;  %v1199_v36 = vsel %vm1198_vm7, %v1197_v35, %v1192_v38 }
 0x2c0   :  { %v1204_v4 = vrot.slane %v1121_v9, %v1203_v44 }
 0x2c1   :  { %v1084_v13 = vpop.xlane.xlu0 %1083 }
 0x2c2   :  { %v1122_v51 = vadd.f32 %v2297_v8, %v1084_v13  ;;  %v1206_v19 = vsel %vm1205_vm8, %v1204_v4, %v1199_v36 }
 0x2c4   :  { %v1211_v12 = vrot.slane %v1122_v51, %v1210_v29 }
 0x2c5   :  { %v1087_v49 = vpop.xlane.xlu0 %1086 }
 0x2c6   :  { %v1123_v2 = vadd.f32 %v2297_v8, %v1087_v49  ;;  %v1213_v15 = vsel %vm1212_vm9, %v1211_v12, %v1206_v19 }
 0x2c8   :  { %v1218_v48 = vrot.slane %v1123_v2, %v1217_v58 }
 0x2ca   :  { %v1220_v26 = vsel %vm1219_vm10, %v1218_v48, %v1213_v15 }
 0x2cc   :  { %v1093_v28 = vpop.xlane.xlu0 %1092 }
 0x2cd   :  { %v1125_v16 = vadd.f32 %v2297_v8, %v1093_v28 }
 0x2cf   :  { %v1232_v56 = vrot.slane %v1125_v16, %v1231_v14 }
 0x2d0   :  { %v1096_v54 = vpop.xlane.xlu0 %1095 }
 0x2d1   :  { %v1126_v24 = vadd.f32 %v2297_v8, %v1096_v54 }
 0x2d3   :  { %v1239_v25 = vrot.slane %v1126_v24, %v1238_v43 }
 0x2d4   :  { %v1099_v55 = vpop.xlane.xlu0 %1098 }
 0x2d5   :  { %v1127_v20 = vadd.f32 %v2297_v8, %v1099_v55 }
 0x2d7   :  { %v1246_v59 = vrot.slane %v1127_v20, %v1245_v60 }
 0x2d8   :  { %v1102_v13 = vpop.xlane.xlu0 %1101 }
 0x2d9   :  { %v1128_v53 = vadd.f32 %v2297_v8, %v1102_v13 }
 0x2db   :  { %v1253_v61 = vrot.slane %v1128_v53, %v1252_v62 }
 0x2e0   :  { %v1090_v18 = vpop.xlane.xlu1 %1089 }
 0x2e1   :  { %v1124_v7 = vadd.f32 %v2297_v8, %v1090_v18 }
 0x2e3   :  { %v1225_v49 = vrot.slane %v1124_v7, %v1224_v33 }
 0x2e5   :  { %v1227_v3 = vsel %vm1226_vm11, %v1225_v49, %v1220_v26 }
 0x2e6   :  { %v1234_v28 = vsel %vm1233_vm12, %v1232_v56, %v1227_v3 }
 0x2e7   :  { %v1241_v31 = vsel %vm1240_vm13, %v1239_v25, %v1234_v28 }
 0x2e8   :  { %v1248_v11 = vsel %vm1247_vm14, %v1246_v59, %v1241_v31 }
 0x2e9   :  { %v1255_v17 = vsel %vm1254_vm15, %v1253_v61, %v1248_v11 }
 0x2ea   :  { %1257 = vst [vmem:[#allocation6] sm:$0x1] %v1255_v17 }
 0x2eb   :  { %1758 = shalt.err (!%p1755_p12)
}
 0x2ec   :  { %s1759_s9 = scalar_lea.hbm %s2369_s7, 16 }
 0x2ed   :  { %p1760_p13 = scmp.ne.s32.totalorder %s2369_s7, %s1759_s9  ;;  %p1763_p0 = scmp.lt.u32.totalorder %s1759_s9, %s2369_s7 }
 0x2ef   :  { %p1765_p1 = pnand %p1763_p0, %p1760_p13 }
 0x2f1   :  { %1768 = shalt.err (!%p1765_p1)
}
 0x2f2   :  { %1267 = dma.vmem_to_hbm [thread:$0]  %s1265_s27, 16, %s2369_s7, [#allocation5]  }
 0x2f3   :  { %1771 = dma.done.wait [#allocation5], 16  }
 0x2f4   :  { %1772 = vsyncadd [#allocation5], 4294967280 }
 0x2f5   :  { %1271 = vsyncpa [#allocation4], 1 }
 0x2f6   :  { %1272 = vsyncpa [#allocation5], 1 }

// kernel: tpu_custom_call.1
= control target key start
LH: loop header
LB: loop body
LE: loop exit
PB: predicated region body
PF: predicated region fallthrough
CT: control target
= control target key end

     0   :  { %s2362_s0 = inlined_call_operand.vmem [shape: f32[128,16], index: 0, kind: input, shape index: {}]   ;;  %s2363_s1 = inlined_call_operand.vmem [shape: bf16[16,256], index: 1, kind: input, shape index: {}]   ;;  %s2364_s2 = inlined_call_operand.vmem [shape: f32[1,256], index: 2, kind: input, shape index: {}]   ;;  %s2365_s3 = inlined_call_operand.hbm [shape: bf16[256,256], index: 3, kind: input, shape index: {}]   ;;  %s2366_s4 = inlined_call_operand.vmem [shape: f32[1,256], index: 4, kind: input, shape index: {}]   ;;  %s2367_s5 = inlined_call_operand.vmem [shape: f32[1,256], index: 5, kind: input, shape index: {}]   ;;  %s2368_s6 = inlined_call_operand.<no memory space> [shape: f32[1,1], index: 6, kind: input, shape index: {}]   ;;  %s2369_s7 = inlined_call_operand.hbm [shape: f32[1,128], index: 7, kind: output, shape index: {}]  }
   0x1   :  { %v12_v0 = vstv %s2368_s6 }
   0x2   :  { %13 = vst [vmem:[#allocation2] sm:$0x1] %v12_v0 }
   0x3   :  { %14 = vsyncpa [#allocation4], 0 }
   0x4   :  { %15 = vsyncpa [#allocation5], 0  ;;  %s1773_s26 = smov [#allocation3]   ;;  %s1725_s30 = scalar_lea.hbm %s2365_s3, 4096 }
   0x5   :  { %s27_s27 = sshll.u32 %s1773_s26, 4  ;;  %p1726_p0 = scmp.ne.s32.totalorder %s2365_s3, %s1725_s30  ;;  %s28_s27 = int_to_ptr.vmem [resolvable:$true] %s27_s27 }
   0x6   :  { %p1729_p1 = scmp.lt.u32.totalorder %s1725_s30, %s2365_s3 }
   0x8   :  { %p1731_p2 = pnand %p1729_p1, %p1726_p0 }
   0xa   :  { %1734 = shalt.err (!%p1731_p2)
}
   0xb   :  { %s1735_s6 = scalar_lea.vmem %s28_s27, 4096  ;;  %p1740_p4 = scmp.lt.s32.totalorder %s28_s27, %s28_s27 }
   0xc   :  { %p1736_p3 = scmp.ne.s32.totalorder %s28_s27, %s1735_s6  ;;  %p1741_p5 = scmp.lt.s32.totalorder %s1735_s6, %s1735_s6 }
   0xe   :  { %p1742_p6 = por %p1741_p5, %p1740_p4 }
  0x10   :  { %p1743_p7 = pnand %p1742_p6, %p1736_p3 }
  0x12   :  { %1746 = shalt.err (!%p1743_p7)
}
  0x13   :  { %s1774_s12 = smov 128   ;;  %s1775_s13 = smov 8  }
  0x14   :  { %33 = dma.hbm_to_vmem [thread:$0]  %s2365_s3, 4096, %s28_s27, [#allocation4], %s1774_s12, %s1774_s12, %s1775_s13  }
  0x15   :  { %1769 = dma.done.wait [#allocation4], 4096  }
  0x16   :  { %1770 = vsyncadd [#allocation4], 4294963200  ;;  %v1776_v1 = vmov 0   ;;  %v1418_v2 = vld [vmem:[%s2363_s1 + $0x4] ss:$8 sps:$4 sm:$0xff]   ;;  %vm92_vm0 = vcmask 130048   ;;  %v72_v60 = vlaneseq }
  0x17   :  { %149 = vmatprep.mubr.bf16.mxu0 %v1776_v1  ;;  %1416 = vset.pattern.permute.xlu1 %v1776_v1  ;;  %v1420_v3 = vld [vmem:[%s2363_s1] ss:$8 sps:$4 sm:$0xff]   ;;  %v46_v7 = vld [vmem:[%s2362_s0 + $0x10] sm:$0xff]  ;;  %v47_v8 = vld [vmem:[%s2362_s0 + $0x18] sm:$0xff]  ;;  %vm1156_vm1 = vcmask 130112   ;;  %vm1163_vm2 = vcmask 195712  }
  0x18   :  { %1417 = vset.pattern.permute.xlu0 %v1776_v1  ;;  %v44_v4 = vld [vmem:[%s2362_s0] sm:$0xff]  ;;  %v45_v5 = vld [vmem:[%s2362_s0 + $0x8] sm:$0xff]  ;;  %117 = vmatprep.subr.bf16.mxu0 %v1418_v2  ;;  %v61_v12 = vpack.c.bf16 %v47_v8, %v46_v7  ;;  %v1424_v13 = vld [vmem:[#allocation3 + $0x10] ss:$8 sps:$4 sm:$0xff]   ;;  %v1906_v61 = vshrl.u32 %v72_v60, 7  ;;  %vm1170_vm3 = vcmask 261312  }
  0x19   :  { %v60_v6 = vpack.c.bf16 %v45_v5, %v44_v4  ;;  %118 = vmatpush1.bf16.msra.mxu0 %v1420_v3  ;;  %v1421_v9 = vld [vmem:[#allocation3] ss:$8 sps:$4 sm:$0xff]   ;;  %v1423_v10 = vld [vmem:[#allocation3 + $0x4] ss:$8 sps:$4 sm:$0xff]   ;;  %v1426_v11 = vld [vmem:[#allocation3 + $0x14] ss:$8 sps:$4 sm:$0xff]  }
  0x1a   :  { %674 = vmatprep.subr.bf16.mxu0 %v1423_v10  ;;  %1379 = vmatprep.subr.bf16.mxu1 %v1423_v10  ;;  %v1429_v14 = vld [vmem:[#allocation3 + $0x24] ss:$8 sps:$4 sm:$0xff]   ;;  %v1427_v17 = vld [vmem:[#allocation3 + $0x20] ss:$8 sps:$4 sm:$0xff]   ;;  %v1432_v18 = vld [vmem:[#allocation3 + $0x34] ss:$8 sps:$4 sm:$0xff]  }
  0x1b   :  { %1395 = vmatpush1.bf16.msra.mxu1 %v1421_v9  ;;  %v48_v15 = vld [vmem:[%s2362_s0 + $0x20] sm:$0xff]  ;;  %v49_v16 = vld [vmem:[%s2362_s0 + $0x28] sm:$0xff]  ;;  %v1430_v19 = vld [vmem:[#allocation3 + $0x30] ss:$8 sps:$4 sm:$0xff]   ;;  %v1909_v62 = vsub.s32 0, %v1906_v61  ;;  %v1915_v0 = vsub.s32 1, %v1906_v61 }
  0x1c   :  { %1275 = vmatmul.mubr.msk.bf16.vlgmr.msra.gmra.mrb[0].mxu0 %vm92_vm0, %v60_v6  ;;  %1380 = vmatprep.subr.bf16.mxu1 %v1426_v11  ;;  %v62_v20 = vpack.c.bf16 %v49_v16, %v48_v15  ;;  %v1435_v21 = vld [vmem:[#allocation3 + $0x44] ss:$8 sps:$4 sm:$0xff]   ;;  %v51_v23 = vld [vmem:[%s2362_s0 + $0x38] sm:$0xff]  ;;  %v1433_v24 = vld [vmem:[#allocation3 + $0x40] ss:$8 sps:$4 sm:$0xff]   ;;  %vm1177_vm4 = vcmask 326912  }
  0x1d   :  { %159 = vmatprep.mubr.bf16.mxu0 %v1776_v1  ;;  %675 = vmatpush1.bf16.msra.mxu0 %v1421_v9  ;;  %v50_v22 = vld [vmem:[%s2362_s0 + $0x30] sm:$0xff]  ;;  %v52_v29 = vld [vmem:[%s2362_s0 + $0x40] sm:$0xff]  ;;  %v53_v30 = vld [vmem:[%s2362_s0 + $0x48] sm:$0xff]  ;;  %vm1184_vm5 = vcmask 392512   ;;  %vm1191_vm6 = vcmask 458112   ;;  %vm1198_vm7 = vcmask 523712  }
  0x1e   :  { %676 = vmatprep.subr.bf16.mxu0 %v1426_v11  ;;  %v1438_v25 = vld [vmem:[#allocation3 + $0x54] ss:$8 sps:$4 sm:$0xff]   ;;  %v63_v26 = vpack.c.bf16 %v51_v23, %v50_v22  ;;  %v1436_v27 = vld [vmem:[#allocation3 + $0x50] ss:$8 sps:$4 sm:$0xff]   ;;  %v1441_v28 = vld [vmem:[#allocation3 + $0x64] ss:$8 sps:$4 sm:$0xff]   ;;  %v64_v32 = vpack.c.bf16 %v53_v30, %v52_v29 }
  0x1f   :  { %1396 = vmatpush1.bf16.msra.mxu1 %v1424_v13  ;;  %v1439_v31 = vld [vmem:[#allocation3 + $0x60] ss:$8 sps:$4 sm:$0xff]   ;;  %v54_v33 = vld [vmem:[%s2362_s0 + $0x50] sm:$0xff]  ;;  %v55_v34 = vld [vmem:[%s2362_s0 + $0x58] sm:$0xff]  ;;  %vm1205_vm8 = vcmask 589312   ;;  %vm1212_vm9 = vcmask 654912  }
  0x20   :  { %1381 = vmatprep.subr.bf16.mxu1 %v1429_v14  ;;  %v65_v35 = vpack.c.bf16 %v55_v34, %v54_v33  ;;  %v56_v36 = vld [vmem:[%s2362_s0 + $0x60] sm:$0xff]  ;;  %v57_v37 = vld [vmem:[%s2362_s0 + $0x68] sm:$0xff]  ;;  %v58_v39 = vld [vmem:[%s2362_s0 + $0x70] sm:$0xff]  ;;  %vm1219_vm10 = vcmask 720512   ;;  %vm1226_vm11 = vcmask 786112   ;;  %vm1233_vm12 = vcmask 851712  }
  0x21   :  { %677 = vmatpush1.bf16.msra.mxu0 %v1424_v13  ;;  %v66_v38 = vpack.c.bf16 %v57_v37, %v56_v36  ;;  %v59_v40 = vld [vmem:[%s2362_s0 + $0x78] sm:$0xff]  ;;  %v1447_v44 = vld [vmem:[#allocation3 + $0x84] ss:$8 sps:$4 sm:$0xff]   ;;  %v1445_v45 = vld [vmem:[#allocation3 + $0x80] ss:$8 sps:$4 sm:$0xff]   ;;  %vm1240_vm13 = vcmask 917312  }
  0x22   :  { %678 = vmatprep.subr.bf16.mxu0 %v1429_v14  ;;  %v67_v41 = vpack.c.bf16 %v59_v40, %v58_v39  ;;  %v1444_v42 = vld [vmem:[#allocation3 + $0x74] ss:$8 sps:$4 sm:$0xff]   ;;  %v1442_v43 = vld [vmem:[#allocation3 + $0x70] ss:$8 sps:$4 sm:$0xff]   ;;  %v1453_v48 = vld [vmem:[#allocation3 + $0xa4] ss:$8 sps:$4 sm:$0xff]  }
  0x23   :  { %1397 = vmatpush1.bf16.msra.mxu1 %v1427_v17  ;;  %v1450_v46 = vld [vmem:[#allocation3 + $0x94] ss:$8 sps:$4 sm:$0xff]   ;;  %v1448_v47 = vld [vmem:[#allocation3 + $0x90] ss:$8 sps:$4 sm:$0xff]   ;;  %v1451_v49 = vld [vmem:[#allocation3 + $0xa0] ss:$8 sps:$4 sm:$0xff]  }
  0x24   :  { %1276 = vmatmul.mubr.msk.bf16.gmra.mrb[4].mxu0 %vm92_vm0, %v61_v12  ;;  %1382 = vmatprep.subr.bf16.mxu1 %v1432_v18  ;;  %v1456_v50 = vld [vmem:[#allocation3 + $0xb4] ss:$8 sps:$4 sm:$0xff]   ;;  %v1454_v51 = vld [vmem:[#allocation3 + $0xb0] ss:$8 sps:$4 sm:$0xff]   ;;  %v1459_v52 = vld [vmem:[#allocation3 + $0xc4] ss:$8 sps:$4 sm:$0xff]  }
  0x25   :  { %169 = vmatprep.mubr.bf16.mxu0 %v1776_v1  ;;  %679 = vmatpush1.bf16.msra.mxu0 %v1427_v17  ;;  %v1457_v53 = vld [vmem:[#allocation3 + $0xc0] ss:$8 sps:$4 sm:$0xff]   ;;  %v1462_v54 = vld [vmem:[#allocation3 + $0xd4] ss:$8 sps:$4 sm:$0xff]   ;;  %v1460_v55 = vld [vmem:[#allocation3 + $0xd0] ss:$8 sps:$4 sm:$0xff]  }
  0x26   :  { %680 = vmatprep.subr.bf16.mxu0 %v1432_v18  ;;  %v1465_v56 = vld [vmem:[#allocation3 + $0xe4] ss:$8 sps:$4 sm:$0xff]   ;;  %v1463_v57 = vld [vmem:[#allocation3 + $0xe0] ss:$8 sps:$4 sm:$0xff]   ;;  %v1468_v58 = vld [vmem:[#allocation3 + $0xf4] ss:$8 sps:$4 sm:$0xff]  }
  0x27   :  { %1398 = vmatpush1.bf16.msra.mxu1 %v1430_v19  ;;  %v1466_v59 = vld [vmem:[#allocation3 + $0xf0] ss:$8 sps:$4 sm:$0xff]   ;;  %v70_v63 = vld [vmem:[%s2364_s2] sm:$0x3]  ;;  %vm1247_vm14 = vcmask 982912   ;;  %vm1254_vm15 = vcmask 1048512  }
  0x28   :  { %1383 = vmatprep.subr.bf16.mxu1 %v1435_v21  ;;  %v1921_v2 = vrot.slane %v70_v63, %v1915_v0 }
  0x29   :  { %681 = vmatpush1.bf16.msra.mxu0 %v1430_v19 }
  0x2a   :  { %682 = vmatprep.subr.bf16.mxu0 %v1435_v21 }
  0x2b   :  { %1399 = vmatpush1.bf16.msra.mxu1 %v1433_v24 }
  0x2c   :  { %1277 = vmatmul.mubr.msk.bf16.gmra.mrb[8].mxu0 %vm92_vm0, %v62_v20  ;;  %1384 = vmatprep.subr.bf16.mxu1 %v1438_v25 }
  0x2d   :  { %179 = vmatprep.mubr.bf16.mxu0 %v1776_v1  ;;  %683 = vmatpush1.bf16.msra.mxu0 %v1433_v24 }
  0x2e   :  { %684 = vmatprep.subr.bf16.mxu0 %v1438_v25 }
  0x2f   :  { %1400 = vmatpush1.bf16.msra.mxu1 %v1436_v27 }
  0x30   :  { %1385 = vmatprep.subr.bf16.mxu1 %v1441_v28 }
  0x31   :  { %685 = vmatpush1.bf16.msra.mxu0 %v1436_v27 }
  0x32   :  { %686 = vmatprep.subr.bf16.mxu0 %v1441_v28 }
  0x33   :  { %1401 = vmatpush1.bf16.msra.mxu1 %v1439_v31 }
  0x34   :  { %1278 = vmatmul.mubr.msk.bf16.gmra.mrb[12].mxu0 %vm92_vm0, %v63_v26  ;;  %1386 = vmatprep.subr.bf16.mxu1 %v1444_v42 }
  0x35   :  { %189 = vmatprep.mubr.bf16.mxu0 %v1776_v1  ;;  %687 = vmatpush1.bf16.msra.mxu0 %v1439_v31 }
  0x36   :  { %688 = vmatprep.subr.bf16.mxu0 %v1444_v42 }
  0x37   :  { %1402 = vmatpush1.bf16.msra.mxu1 %v1442_v43 }
  0x38   :  { %1387 = vmatprep.subr.bf16.mxu1 %v1447_v44 }
  0x39   :  { %689 = vmatpush1.bf16.msra.mxu0 %v1442_v43 }
  0x3a   :  { %690 = vmatprep.subr.bf16.mxu0 %v1447_v44 }
  0x3b   :  { %1403 = vmatpush1.bf16.msra.mxu1 %v1445_v45 }
  0x3c   :  { %1279 = vmatmul.mubr.msk.bf16.gmra.mrb[16].mxu0 %vm92_vm0, %v64_v32  ;;  %1388 = vmatprep.subr.bf16.mxu1 %v1450_v46 }
  0x3d   :  { %199 = vmatprep.mubr.bf16.mxu0 %v1776_v1  ;;  %691 = vmatpush1.bf16.msra.mxu0 %v1445_v45 }
  0x3e   :  { %692 = vmatprep.subr.bf16.mxu0 %v1450_v46 }
  0x3f   :  { %1404 = vmatpush1.bf16.msra.mxu1 %v1448_v47 }
  0x40   :  { %1389 = vmatprep.subr.bf16.mxu1 %v1453_v48 }
  0x41   :  { %693 = vmatpush1.bf16.msra.mxu0 %v1448_v47 }
  0x42   :  { %694 = vmatprep.subr.bf16.mxu0 %v1453_v48 }
  0x43   :  { %1405 = vmatpush1.bf16.msra.mxu1 %v1451_v49 }
  0x44   :  { %1280 = vmatmul.mubr.msk.bf16.gmra.mrb[20].mxu0 %vm92_vm0, %v65_v35  ;;  %1390 = vmatprep.subr.bf16.mxu1 %v1456_v50 }
  0x45   :  { %209 = vmatprep.mubr.bf16.mxu0 %v1776_v1  ;;  %695 = vmatpush1.bf16.msra.mxu0 %v1451_v49 }
  0x46   :  { %696 = vmatprep.subr.bf16.mxu0 %v1456_v50 }
  0x47   :  { %1406 = vmatpush1.bf16.msra.mxu1 %v1454_v51 }
  0x48   :  { %1391 = vmatprep.subr.bf16.mxu1 %v1459_v52 }
  0x49   :  { %697 = vmatpush1.bf16.msra.mxu0 %v1454_v51 }
  0x4a   :  { %698 = vmatprep.subr.bf16.mxu0 %v1459_v52 }
  0x4b   :  { %1407 = vmatpush1.bf16.msra.mxu1 %v1457_v53 }
  0x4c   :  { %1281 = vmatmul.mubr.msk.bf16.gmra.mrb[24].mxu0 %vm92_vm0, %v66_v38  ;;  %1392 = vmatprep.subr.bf16.mxu1 %v1462_v54 }
  0x4d   :  { %219 = vmatprep.mubr.bf16.mxu0 %v1776_v1  ;;  %699 = vmatpush1.bf16.msra.mxu0 %v1457_v53  ;;  %v1918_v1 = vrot.slane %v70_v63, %v1909_v62 }
  0x4e   :  { %700 = vmatprep.subr.bf16.mxu0 %v1462_v54 }
  0x4f   :  { %1408 = vmatpush1.bf16.msra.mxu1 %v1460_v55 }
  0x50   :  { %1393 = vmatprep.subr.bf16.mxu1 %v1465_v56 }
  0x51   :  { %701 = vmatpush1.bf16.msra.mxu0 %v1460_v55 }
  0x52   :  { %702 = vmatprep.subr.bf16.mxu0 %v1465_v56 }
  0x53   :  { %1409 = vmatpush1.bf16.msra.mxu1 %v1463_v57 }
  0x54   :  { %1282 = vmatmul.mubr.msk.bf16.gmra.mrb[28].mxu0 %vm92_vm0, %v67_v41  ;;  %1394 = vmatprep.subr.bf16.mxu1 %v1468_v58 }
  0x55   :  { %703 = vmatpush1.bf16.msra.mxu0 %v1463_v57 }
  0x56   :  { %704 = vmatprep.subr.bf16.mxu0 %v1468_v58 }
  0x57   :  { %1410 = vmatpush1.bf16.msra.mxu1 %v1466_v59 }
  0x59   :  { %705 = vmatpush1.bf16.msra.mxu0 %v1466_v59 }
  0xef   :  { %v151_v3 = vpop.f32.mrb[0].mxu0 }
  0xf0   :  { %v1924_v4 = vadd.f32 %v151_v3, %v1918_v1  ;;  %v153_v5 = vpop.f32.mrb[1].mxu0 }
  0xf1   :  { %v1927_v6 = vadd.f32 %v153_v5, %v1921_v2  ;;  %v155_v7 = vpop.f32.mrb[2].mxu0 }
  0xf2   :  { %v1283_v8 = vmul.f32 -1.442695, %v1924_v4  ;;  %v1931_v9 = vadd.f32 %v155_v7, %v1918_v1  ;;  %v157_v10 = vpop.f32.mrb[3].mxu0 }
  0xf3   :  { %v1284_v11 = vmul.f32 -1.442695, %v1927_v6  ;;  %v1935_v12 = vadd.f32 %v157_v10, %v1921_v2 }
  0xf4   :  { %1469 = vpow2.f32 %v1283_v8  ;;  %v1285_v13 = vmul.f32 -1.442695, %v1931_v9 }
  0xf5   :  { %1471 = vpow2.f32 %v1284_v11  ;;  %v1286_v14 = vmul.f32 -1.442695, %v1935_v12 }
  0xf6   :  { %1473 = vpow2.f32 %v1285_v13 }
  0xf7   :  { %1475 = vpow2.f32 %v1286_v14  ;;  %v161_v15 = vpop.f32.mrb[4].mxu0 }
  0xf8   :  { %v1940_v16 = vadd.f32 %v161_v15, %v1918_v1  ;;  %v163_v17 = vpop.f32.mrb[5].mxu0 }
  0xf9   :  { %v1943_v18 = vadd.f32 %v163_v17, %v1921_v2  ;;  %v165_v19 = vpop.f32.mrb[6].mxu0 }
  0xfa   :  { %v1287_v20 = vmul.f32 -1.442695, %v1940_v16  ;;  %v1947_v21 = vadd.f32 %v165_v19, %v1918_v1  ;;  %v167_v22 = vpop.f32.mrb[7].mxu0 }
  0xfb   :  { %v1288_v23 = vmul.f32 -1.442695, %v1943_v18  ;;  %v1951_v24 = vadd.f32 %v167_v22, %v1921_v2 }
  0xfc   :  { %1477 = vpow2.f32 %v1287_v20  ;;  %v1289_v25 = vmul.f32 -1.442695, %v1947_v21 }
  0xfd   :  { %1479 = vpow2.f32 %v1288_v23  ;;  %v1290_v26 = vmul.f32 -1.442695, %v1951_v24 }
  0xfe   :  { %v1470_v27 = vpop.eup %1469  ;;  %1481 = vpow2.f32 %v1289_v25 }
  0xff   :  { %v1472_v28 = vpop.eup %1471  ;;  %v326_v29 = vadd.f32 1.0, %v1470_v27  ;;  %1483 = vpow2.f32 %v1290_v26  ;;  %v171_v30 = vpop.f32.mrb[8].mxu0 }
 0x100   :  { %v1474_v31 = vpop.eup %1473  ;;  %v327_v32 = vadd.f32 1.0, %v1472_v28  ;;  %v1956_v33 = vadd.f32 %v171_v30, %v1918_v1  ;;  %v173_v34 = vpop.f32.mrb[9].mxu0 }
 0x101   :  { %v1476_v35 = vpop.eup %1475  ;;  %1485 = vrcp.f32 %v326_v29  ;;  %v328_v36 = vadd.f32 1.0, %v1474_v31  ;;  %v1959_v37 = vadd.f32 %v173_v34, %v1921_v2  ;;  %v175_v38 = vpop.f32.mrb[10].mxu0 }
 0x102   :  { %1487 = vrcp.f32 %v327_v32  ;;  %v329_v39 = vadd.f32 1.0, %v1476_v35  ;;  %v1291_v40 = vmul.f32 -1.442695, %v1956_v33  ;;  %v1963_v41 = vadd.f32 %v175_v38, %v1918_v1  ;;  %v177_v42 = vpop.f32.mrb[11].mxu0 }
 0x103   :  { %1489 = vrcp.f32 %v328_v36  ;;  %v1292_v43 = vmul.f32 -1.442695, %v1959_v37  ;;  %v1967_v44 = vadd.f32 %v177_v42, %v1921_v2 }
 0x104   :  { %1491 = vrcp.f32 %v329_v39  ;;  %v1293_v45 = vmul.f32 -1.442695, %v1963_v41 }
 0x105   :  { %1493 = vpow2.f32 %v1291_v40  ;;  %v1294_v46 = vmul.f32 -1.442695, %v1967_v44 }
 0x106   :  { %v1478_v47 = vpop.eup %1477  ;;  %1495 = vpow2.f32 %v1292_v43 }
 0x107   :  { %v1480_v48 = vpop.eup %1479  ;;  %v330_v49 = vadd.f32 1.0, %v1478_v47  ;;  %1497 = vpow2.f32 %v1293_v45  ;;  %v181_v50 = vpop.f32.mrb[12].mxu0 }
 0x108   :  { %v1482_v51 = vpop.eup %1481  ;;  %v331_v52 = vadd.f32 1.0, %v1480_v48  ;;  %1499 = vpow2.f32 %v1294_v46  ;;  %v1972_v53 = vadd.f32 %v181_v50, %v1918_v1  ;;  %v183_v54 = vpop.f32.mrb[13].mxu0 }
 0x109   :  { %v1484_v55 = vpop.eup %1483  ;;  %1501 = vrcp.f32 %v330_v49  ;;  %v332_v56 = vadd.f32 1.0, %v1482_v51  ;;  %v1975_v57 = vadd.f32 %v183_v54, %v1921_v2  ;;  %v185_v58 = vpop.f32.mrb[14].mxu0 }
 0x10a   :  { %1503 = vrcp.f32 %v331_v52  ;;  %v333_v59 = vadd.f32 1.0, %v1484_v55  ;;  %v1295_v63 = vmul.f32 -1.442695, %v1972_v53  ;;  %v1979_v3 = vadd.f32 %v185_v58, %v1918_v1  ;;  %v187_v5 = vpop.f32.mrb[15].mxu0 }
 0x10b   :  { %v1486_v7 = vpop.eup %1485  ;;  %1505 = vrcp.f32 %v332_v56  ;;  %v1296_v8 = vmul.f32 -1.442695, %v1975_v57  ;;  %v1983_v10 = vadd.f32 %v187_v5, %v1921_v2 }
 0x10c   :  { %v1488_v11 = vpop.eup %1487  ;;  %1507 = vrcp.f32 %v333_v59  ;;  %v1297_v13 = vmul.f32 -1.442695, %v1979_v3  ;;  %v422_v19 = vmul.f32 %v1486_v7, %v1924_v4 }
 0x10d   :  { %v1490_v14 = vpop.eup %1489  ;;  %1509 = vpow2.f32 %v1295_v63  ;;  %v1298_v15 = vmul.f32 -1.442695, %v1983_v10  ;;  %v423_v23 = vmul.f32 %v1488_v11, %v1927_v6 }
 0x10e   :  { %v1492_v17 = vpop.eup %1491  ;;  %v424_v20 = vmul.f32 %v1490_v14, %v1931_v9  ;;  %1511 = vpow2.f32 %v1296_v8 }
 0x10f   :  { %v1494_v22 = vpop.eup %1493  ;;  %v425_v25 = vmul.f32 %v1492_v17, %v1935_v12  ;;  %1513 = vpow2.f32 %v1297_v13  ;;  %v191_v26 = vpop.f32.mrb[16].mxu0 }
 0x110   :  { %v1496_v27 = vpop.eup %1495  ;;  %v454_v28 = vpack.c.bf16 %v424_v20, %v422_v19  ;;  %v334_v29 = vadd.f32 1.0, %v1494_v22  ;;  %1515 = vpow2.f32 %v1298_v15  ;;  %v1992_v30 = vadd.f32 %v191_v26, %v1918_v1  ;;  %v193_v31 = vpop.f32.mrb[17].mxu0 }
 0x111   :  { %v1498_v32 = vpop.eup %1497  ;;  %v335_v4 = vadd.f32 1.0, %v1496_v27  ;;  %v1995_v9 = vadd.f32 %v193_v31, %v1921_v2  ;;  %v195_v34 = vpop.f32.mrb[18].mxu0  ;;  %v455_v35 = vpack.c.bf16 %v425_v25, %v423_v23 }
 0x112   :  { %v1500_v6 = vpop.eup %1499  ;;  %1517 = vrcp.f32 %v334_v29  ;;  %v336_v12 = vadd.f32 1.0, %v1498_v32  ;;  %v1299_v36 = vmul.f32 -1.442695, %v1992_v30  ;;  %v1999_v38 = vadd.f32 %v195_v34, %v1918_v1  ;;  %v197_v39 = vpop.f32.mrb[19].mxu0 }
 0x113   :  { %v1502_v40 = vpop.eup %1501  ;;  %1519 = vrcp.f32 %v335_v4  ;;  %v337_v42 = vadd.f32 1.0, %v1500_v6  ;;  %v1300_v43 = vmul.f32 -1.442695, %v1995_v9  ;;  %v2003_v45 = vadd.f32 %v197_v39, %v1921_v2  ;;  %706 = vmatprep.mubr.bf16.mxu0 %v455_v35 }
 0x114   :  { %v1504_v46 = vpop.eup %1503  ;;  %1521 = vrcp.f32 %v336_v12  ;;  %v1301_v47 = vmul.f32 -1.442695, %v1999_v38  ;;  %707 = vmatmul.mubr.bf16.vlgmr.msra.gmra.mrb[32].mxu0 %v454_v28  ;;  %v426_v51 = vmul.f32 %v1502_v40, %v1940_v16 }
 0x115   :  { %v1506_v48 = vpop.eup %1505  ;;  %1523 = vrcp.f32 %v337_v42  ;;  %v1302_v49 = vmul.f32 -1.442695, %v2003_v45  ;;  %v427_v55 = vmul.f32 %v1504_v46, %v1943_v18 }
 0x116   :  { %v1508_v50 = vpop.eup %1507  ;;  %v428_v52 = vmul.f32 %v1506_v48, %v1947_v21  ;;  %1525 = vpow2.f32 %v1299_v36 }
 0x117   :  { %v1510_v54 = vpop.eup %1509  ;;  %v429_v56 = vmul.f32 %v1508_v50, %v1951_v24  ;;  %1527 = vpow2.f32 %v1300_v43  ;;  %v201_v58 = vpop.f32.mrb[20].mxu0 }
 0x118   :  { %v1512_v59 = vpop.eup %1511  ;;  %v338_v63 = vadd.f32 1.0, %v1510_v54  ;;  %1529 = vpow2.f32 %v1301_v47  ;;  %v2012_v5 = vadd.f32 %v201_v58, %v1918_v1  ;;  %v203_v7 = vpop.f32.mrb[21].mxu0  ;;  %v456_v8 = vpack.c.bf16 %v428_v52, %v426_v51 }
 0x119   :  { %v1514_v11 = vpop.eup %1513  ;;  %v339_v16 = vadd.f32 1.0, %v1512_v59  ;;  %1531 = vpow2.f32 %v1302_v49  ;;  %v2015_v21 = vadd.f32 %v203_v7, %v1921_v2  ;;  %v205_v13 = vpop.f32.mrb[22].mxu0  ;;  %v457_v18 = vpack.c.bf16 %v429_v56, %v427_v55 }
 0x11a   :  { %v1516_v14 = vpop.eup %1515  ;;  %1533 = vrcp.f32 %v338_v63  ;;  %v340_v24 = vadd.f32 1.0, %v1514_v11  ;;  %v1303_v15 = vmul.f32 -1.442695, %v2012_v5  ;;  %v2019_v17 = vadd.f32 %v205_v13, %v1918_v1  ;;  %v207_v19 = vpop.f32.mrb[23].mxu0 }
 0x11b   :  { %1535 = vrcp.f32 %v339_v16  ;;  %v341_v20 = vadd.f32 1.0, %v1516_v14  ;;  %v1304_v22 = vmul.f32 -1.442695, %v2015_v21  ;;  %v2023_v23 = vadd.f32 %v207_v19, %v1921_v2  ;;  %716 = vmatprep.mubr.bf16.mxu0 %v457_v18 }
 0x11c   :  { %v1518_v25 = vpop.eup %1517  ;;  %1537 = vrcp.f32 %v340_v24  ;;  %v1305_v26 = vmul.f32 -1.442695, %v2019_v17  ;;  %717 = vmatmul.mubr.bf16.gmra.mrb[36].mxu0 %v456_v8 }
 0x11d   :  { %v1520_v27 = vpop.eup %1519  ;;  %1539 = vrcp.f32 %v341_v20  ;;  %v1306_v28 = vmul.f32 -1.442695, %v2023_v23  ;;  %v430_v32 = vmul.f32 %v1518_v25, %v1956_v33 }
 0x11e   :  { %v1522_v29 = vpop.eup %1521  ;;  %1541 = vpow2.f32 %v1303_v15  ;;  %v431_v6 = vmul.f32 %v1520_v27, %v1959_v37 }
 0x11f   :  { %v1524_v31 = vpop.eup %1523  ;;  %v432_v4 = vmul.f32 %v1522_v29, %v1963_v41  ;;  %1543 = vpow2.f32 %v1304_v22  ;;  %v211_v34 = vpop.f32.mrb[24].mxu0 }
 0x120   :  { %v1526_v35 = vpop.eup %1525  ;;  %v433_v12 = vmul.f32 %v1524_v31, %v1967_v44  ;;  %1545 = vpow2.f32 %v1305_v26  ;;  %v2032_v36 = vadd.f32 %v211_v34, %v1918_v1  ;;  %v213_v39 = vpop.f32.mrb[25].mxu0 }
 0x121   :  { %v1528_v40 = vpop.eup %1527  ;;  %v342_v42 = vadd.f32 1.0, %v1526_v35  ;;  %1547 = vpow2.f32 %v1306_v28  ;;  %v2035_v43 = vadd.f32 %v213_v39, %v1921_v2  ;;  %v215_v33 = vpop.f32.mrb[26].mxu0  ;;  %v458_v41 = vpack.c.bf16 %v432_v4, %v430_v32 }
 0x122   :  { %v1530_v46 = vpop.eup %1529  ;;  %v343_v47 = vadd.f32 1.0, %v1528_v40  ;;  %v2038_v48 = vadd.f32 %v215_v33, %v1918_v1  ;;  %v217_v37 = vpop.f32.mrb[27].mxu0  ;;  %v459_v44 = vpack.c.bf16 %v433_v12, %v431_v6  ;;  %v1307_v51 = vmul.f32 -1.442695, %v2032_v36 }
 0x123   :  { %v1532_v49 = vpop.eup %1531  ;;  %1549 = vrcp.f32 %v342_v42  ;;  %v344_v50 = vadd.f32 1.0, %v1530_v46  ;;  %v2042_v52 = vadd.f32 %v217_v37, %v1921_v2  ;;  %v1308_v56 = vmul.f32 -1.442695, %v2035_v43 }
 0x124   :  { %v1534_v54 = vpop.eup %1533  ;;  %1551 = vrcp.f32 %v343_v47  ;;  %v345_v55 = vadd.f32 1.0, %v1532_v49  ;;  %726 = vmatprep.mubr.bf16.mxu0 %v459_v44  ;;  %v1309_v59 = vmul.f32 -1.442695, %v2038_v48 }
 0x125   :  { %v1536_v58 = vpop.eup %1535  ;;  %1553 = vrcp.f32 %v344_v50  ;;  %727 = vmatmul.mubr.bf16.gmra.mrb[40].mxu0 %v458_v41  ;;  %v1310_v7 = vmul.f32 -1.442695, %v2042_v52  ;;  %v434_v11 = vmul.f32 %v1534_v54, %v1972_v53 }
 0x126   :  { %v1538_v63 = vpop.eup %1537  ;;  %1555 = vrcp.f32 %v345_v55  ;;  %v435_v29 = vmul.f32 %v1536_v58, %v1975_v57 }
 0x127   :  { %v1540_v8 = vpop.eup %1539  ;;  %v436_v16 = vmul.f32 %v1538_v63, %v1979_v3  ;;  %1557 = vpow2.f32 %v1307_v51  ;;  %v221_v13 = vpop.f32.mrb[28].mxu0 }
 0x128   :  { %v1542_v18 = vpop.eup %1541  ;;  %1559 = vpow2.f32 %v1308_v56  ;;  %v2050_v14 = vadd.f32 %v221_v13, %v1918_v1  ;;  %v223_v24 = vpop.f32.mrb[29].mxu0  ;;  %v437_v15 = vmul.f32 %v1540_v8, %v1983_v10 }
 0x129   :  { %v1544_v19 = vpop.eup %1543  ;;  %v346_v20 = vadd.f32 1.0, %v1542_v18  ;;  %1561 = vpow2.f32 %v1309_v59  ;;  %v2054_v22 = vadd.f32 %v223_v24, %v1921_v2  ;;  %v225_v25 = vpop.f32.mrb[30].mxu0  ;;  %v460_v53 = vpack.c.bf16 %v436_v16, %v434_v11 }
 0x12a   :  { %v1546_v26 = vpop.eup %1545  ;;  %v347_v3 = vadd.f32 1.0, %v1544_v19  ;;  %1563 = vpow2.f32 %v1310_v7  ;;  %v2057_v27 = vadd.f32 %v225_v25, %v1918_v1  ;;  %v227_v28 = vpop.f32.mrb[31].mxu0  ;;  %v1311_v32 = vmul.f32 -1.442695, %v2050_v14 }
 0x12b   :  { %v1548_v31 = vpop.eup %1547  ;;  %1565 = vrcp.f32 %v346_v20  ;;  %v348_v10 = vadd.f32 1.0, %v1546_v26  ;;  %v2062_v4 = vadd.f32 %v227_v28, %v1921_v2  ;;  %v1312_v35 = vmul.f32 -1.442695, %v2054_v22 }
 0x12c   :  { %1567 = vrcp.f32 %v347_v3  ;;  %v349_v34 = vadd.f32 1.0, %v1548_v31  ;;  %v461_v6 = vpack.c.bf16 %v437_v15, %v435_v29  ;;  %v1313_v1 = vmul.f32 -1.442695, %v2057_v27 }
 0x12d   :  { %v1550_v12 = vpop.eup %1549  ;;  %1569 = vrcp.f32 %v348_v10  ;;  %v1314_v57 = vmul.f32 -1.442695, %v2062_v4 }
 0x12e   :  { %v1552_v39 = vpop.eup %1551  ;;  %1571 = vrcp.f32 %v349_v34  ;;  %736 = vmatprep.mubr.bf16.mxu1 %v461_v6  ;;  %v438_v2 = vmul.f32 %v1550_v12, %v1992_v30 }
 0x12f   :  { %v1554_v40 = vpop.eup %1553  ;;  %1573 = vpow2.f32 %v1311_v32  ;;  %737 = vmatmul.mubr.bf16.vlgmr.msra.gmra.mrb[0].mxu1 %v460_v53  ;;  %v439_v46 = vmul.f32 %v1552_v39, %v1995_v9 }
 0x130   :  { %v1556_v42 = vpop.eup %1555  ;;  %v440_v33 = vmul.f32 %v1554_v40, %v1999_v38  ;;  %1575 = vpow2.f32 %v1312_v35 }
 0x131   :  { %v1558_v41 = vpop.eup %1557  ;;  %v441_v47 = vmul.f32 %v1556_v42, %v2003_v45  ;;  %1577 = vpow2.f32 %v1313_v1 }
 0x132   :  { %v1560_v37 = vpop.eup %1559  ;;  %v350_v44 = vadd.f32 1.0, %v1558_v41  ;;  %1579 = vpow2.f32 %v1314_v57  ;;  %v462_v49 = vpack.c.bf16 %v440_v33, %v438_v2 }
 0x133   :  { %v1562_v50 = vpop.eup %1561  ;;  %v351_v51 = vadd.f32 1.0, %v1560_v37  ;;  %v463_v54 = vpack.c.bf16 %v441_v47, %v439_v46 }
 0x134   :  { %v1564_v55 = vpop.eup %1563  ;;  %1581 = vrcp.f32 %v350_v44  ;;  %v352_v56 = vadd.f32 1.0, %v1562_v50 }
 0x135   :  { %v1566_v30 = vpop.eup %1565  ;;  %1583 = vrcp.f32 %v351_v51  ;;  %v353_v38 = vadd.f32 1.0, %v1564_v55  ;;  %746 = vmatprep.mubr.bf16.mxu1 %v463_v54 }
 0x136   :  { %v1568_v58 = vpop.eup %1567  ;;  %1585 = vrcp.f32 %v352_v56  ;;  %v442_v59 = vmul.f32 %v1566_v30, %v2012_v5 }
 0x137   :  { %v1570_v9 = vpop.eup %1569  ;;  %1587 = vrcp.f32 %v353_v38  ;;  %747 = vmatmul.mubr.bf16.gmra.mrb[4].mxu1 %v462_v49  ;;  %v443_v8 = vmul.f32 %v1568_v58, %v2015_v21 }
 0x138   :  { %v1572_v45 = vpop.eup %1571  ;;  %v444_v63 = vmul.f32 %v1570_v9, %v2019_v17 }
 0x139   :  { %v1574_v7 = vpop.eup %1573  ;;  %v445_v11 = vmul.f32 %v1572_v45, %v2023_v23 }
 0x13a   :  { %v1576_v16 = vpop.eup %1575  ;;  %v354_v13 = vadd.f32 1.0, %v1574_v7  ;;  %v464_v18 = vpack.c.bf16 %v444_v63, %v442_v59 }
 0x13b   :  { %v1578_v24 = vpop.eup %1577  ;;  %v355_v15 = vadd.f32 1.0, %v1576_v16  ;;  %v465_v19 = vpack.c.bf16 %v445_v11, %v443_v8 }
 0x13c   :  { %v1580_v20 = vpop.eup %1579  ;;  %1589 = vrcp.f32 %v354_v13  ;;  %v356_v25 = vadd.f32 1.0, %v1578_v24 }
 0x13d   :  { %1591 = vrcp.f32 %v355_v15  ;;  %v357_v53 = vadd.f32 1.0, %v1580_v20  ;;  %756 = vmatprep.mubr.bf16.mxu1 %v465_v19 }
 0x13e   :  { %v1582_v5 = vpop.eup %1581  ;;  %1593 = vrcp.f32 %v356_v25 }
 0x13f   :  { %v1584_v17 = vpop.eup %1583  ;;  %1595 = vrcp.f32 %v357_v53  ;;  %757 = vmatmul.mubr.bf16.gmra.mrb[8].mxu1 %v464_v18  ;;  %v446_v23 = vmul.f32 %v1582_v5, %v2032_v36 }
 0x140   :  { %v1586_v21 = vpop.eup %1585  ;;  %v447_v28 = vmul.f32 %v1584_v17, %v2035_v43 }
 0x141   :  { %v1588_v26 = vpop.eup %1587  ;;  %v448_v3 = vmul.f32 %v1586_v21, %v2038_v48 }
 0x142   :  { %v449_v29 = vmul.f32 %v1588_v26, %v2042_v52  ;;  %v502_v52 = vld [vmem:[%s2366_s4] sm:$0x3] }
 0x143   :  { %v466_v31 = vpack.c.bf16 %v448_v3, %v446_v23  ;;  %v2087_v57 = vrot.slane %v502_v52, %v1909_v62  ;;  %v2090_v40 = vrot.slane %v502_v52, %v1915_v0 }
 0x144   :  { %v467_v10 = vpack.c.bf16 %v449_v29, %v447_v28 }
 0x146   :  { %v1590_v32 = vpop.eup %1589  ;;  %766 = vmatprep.mubr.bf16.mxu1 %v467_v10 }
 0x147   :  { %v1592_v34 = vpop.eup %1591  ;;  %767 = vmatmul.mubr.bf16.gmra.mrb[12].mxu1 %v466_v31  ;;  %v450_v12 = vmul.f32 %v1590_v32, %v2050_v14  ;;  %v1011_v32 = vld [vmem:[%s2367_s5] sm:$0x3]  ;;  %s1777_s5 = smov [#allocation6]  }
 0x148   :  { %v1594_v35 = vpop.eup %1593  ;;  %v451_v36 = vmul.f32 %v1592_v34, %v2054_v22  ;;  %s1264_s27 = sshll.u32 %s1777_s5, 4  ;;  %s1265_s27 = int_to_ptr.vmem [resolvable:$true] %s1264_s27 }
 0x149   :  { %v1596_v6 = vpop.eup %1595  ;;  %v452_v1 = vmul.f32 %v1594_v35, %v2057_v27  ;;  %s1747_s28 = scalar_lea.vmem %s1265_s27, 16  ;;  %s1751_s29 = scalar_lea.vmem %s1265_s27, 32 }
 0x14a   :  { %v453_v48 = vmul.f32 %v1596_v6, %v2062_v4  ;;  %p1748_p8 = scmp.ne.s32.totalorder %s1265_s27, %s1747_s28  ;;  %p1752_p9 = scmp.lt.s32.totalorder %s1265_s27, %s1265_s27 }
 0x14b   :  { %v468_v39 = vpack.c.bf16 %v452_v1, %v450_v12  ;;  %p1753_p10 = scmp.lt.s32.totalorder %s1751_s29, %s1747_s28 }
 0x14c   :  { %v469_v43 = vpack.c.bf16 %v453_v48, %v451_v36  ;;  %v2144_v48 = vrot.slane %v1011_v32, %v1909_v62 }
 0x14d   :  { %p1754_p11 = por %p1753_p10, %p1752_p9 }
 0x14e   :  { %776 = vmatprep.mubr.bf16.mxu1 %v469_v43 }
 0x14f   :  { %777 = vmatmul.mubr.bf16.gmra.mrb[16].mxu1 %v468_v39  ;;  %p1755_p12 = pnand %p1754_p11, %p1748_p8 }
 0x1e7   :  { %v708_v14 = vpop.f32.mrb[32].mxu0 }
 0x1e8   :  { %v2093_v27 = vadd.f32 %v708_v14, %v2087_v57  ;;  %v710_v22 = vpop.f32.mrb[33].mxu0  ;;  %v2150_v14 = vrot.slane %v1011_v32, %v1915_v0 }
 0x1e9   :  { %v2096_v4 = vadd.f32 %v710_v22, %v2090_v40  ;;  %v712_v42 = vpop.f32.mrb[34].mxu0 }
 0x1ea   :  { %v1347_v2 = vmul.f32 -1.442695, %v2093_v27  ;;  %v2100_v33 = vadd.f32 %v712_v42, %v2087_v57  ;;  %v714_v41 = vpop.f32.mrb[35].mxu0 }
 0x1eb   :  { %v1348_v46 = vmul.f32 -1.442695, %v2096_v4  ;;  %v2104_v47 = vadd.f32 %v714_v41, %v2090_v40 }
 0x1ec   :  { %1597 = vpow2.f32 %v1347_v2  ;;  %v1349_v37 = vmul.f32 -1.442695, %v2100_v33 }
 0x1ed   :  { %1599 = vpow2.f32 %v1348_v46  ;;  %v1350_v44 = vmul.f32 -1.442695, %v2104_v47 }
 0x1ee   :  { %1601 = vpow2.f32 %v1349_v37 }
 0x1ef   :  { %1603 = vpow2.f32 %v1350_v44  ;;  %v718_v49 = vpop.f32.mrb[36].mxu0 }
 0x1f0   :  { %v2109_v50 = vadd.f32 %v718_v49, %v2087_v57  ;;  %v720_v51 = vpop.f32.mrb[37].mxu0 }
 0x1f1   :  { %v2112_v54 = vadd.f32 %v720_v51, %v2090_v40  ;;  %v722_v55 = vpop.f32.mrb[38].mxu0 }
 0x1f2   :  { %v1351_v56 = vmul.f32 -1.442695, %v2109_v50  ;;  %v2116_v30 = vadd.f32 %v722_v55, %v2087_v57  ;;  %v724_v38 = vpop.f32.mrb[39].mxu0 }
 0x1f3   :  { %v1352_v58 = vmul.f32 -1.442695, %v2112_v54  ;;  %v2120_v9 = vadd.f32 %v724_v38, %v2090_v40 }
 0x1f4   :  { %1605 = vpow2.f32 %v1351_v56  ;;  %v1353_v45 = vmul.f32 -1.442695, %v2116_v30 }
 0x1f5   :  { %1607 = vpow2.f32 %v1352_v58  ;;  %v1354_v59 = vmul.f32 -1.442695, %v2120_v9 }
 0x1f6   :  { %v1598_v63 = vpop.eup %1597  ;;  %1609 = vpow2.f32 %v1353_v45 }
 0x1f7   :  { %v1600_v7 = vpop.eup %1599  ;;  %v883_v8 = vadd.f32 1.0, %v1598_v63  ;;  %1611 = vpow2.f32 %v1354_v59 }
 0x1f8   :  { %v1602_v11 = vpop.eup %1601  ;;  %v884_v16 = vadd.f32 1.0, %v1600_v7  ;;  %v728_v13 = vpop.f32.mrb[40].mxu0 }
 0x1f9   :  { %v1604_v18 = vpop.eup %1603  ;;  %1613 = vrcp.f32 %v883_v8  ;;  %v885_v24 = vadd.f32 1.0, %v1602_v11  ;;  %v2125_v15 = vadd.f32 %v728_v13, %v2087_v57  ;;  %v730_v19 = vpop.f32.mrb[41].mxu0 }
 0x1fa   :  { %1615 = vrcp.f32 %v884_v16  ;;  %v886_v20 = vadd.f32 1.0, %v1604_v18  ;;  %v2128_v25 = vadd.f32 %v730_v19, %v2090_v40  ;;  %v732_v53 = vpop.f32.mrb[42].mxu0 }
 0x1fb   :  { %1617 = vrcp.f32 %v885_v24  ;;  %v1355_v5 = vmul.f32 -1.442695, %v2125_v15  ;;  %v2132_v17 = vadd.f32 %v732_v53, %v2087_v57  ;;  %v734_v21 = vpop.f32.mrb[43].mxu0 }
 0x1fc   :  { %1619 = vrcp.f32 %v886_v20  ;;  %v1356_v26 = vmul.f32 -1.442695, %v2128_v25  ;;  %v2136_v23 = vadd.f32 %v734_v21, %v2090_v40 }
 0x1fd   :  { %1621 = vpow2.f32 %v1355_v5  ;;  %v1357_v3 = vmul.f32 -1.442695, %v2132_v17 }
 0x1fe   :  { %v1606_v28 = vpop.eup %1605  ;;  %1623 = vpow2.f32 %v1356_v26  ;;  %v1358_v29 = vmul.f32 -1.442695, %v2136_v23 }
 0x1ff   :  { %v1608_v31 = vpop.eup %1607  ;;  %v887_v10 = vadd.f32 1.0, %v1606_v28  ;;  %1625 = vpow2.f32 %v1357_v3 }
 0x200   :  { %v1610_v34 = vpop.eup %1609  ;;  %v888_v35 = vadd.f32 1.0, %v1608_v31  ;;  %1627 = vpow2.f32 %v1358_v29 }
 0x201   :  { %v1612_v6 = vpop.eup %1611  ;;  %1629 = vrcp.f32 %v887_v10  ;;  %v889_v12 = vadd.f32 1.0, %v1610_v34 }
 0x202   :  { %1631 = vrcp.f32 %v888_v35  ;;  %v890_v1 = vadd.f32 1.0, %v1612_v6  ;;  %v738_v36 = vpop.f32.mrb[0].mxu1 }
 0x203   :  { %v1614_v39 = vpop.eup %1613  ;;  %1633 = vrcp.f32 %v889_v12  ;;  %v2147_v43 = vadd.f32 %v738_v36, %v2087_v57  ;;  %v740_v52 = vpop.f32.mrb[1].mxu1 }
 0x204   :  { %v1616_v22 = vpop.eup %1615  ;;  %v979_v42 = vmul.f32 %v1614_v39, %v2093_v27  ;;  %1635 = vrcp.f32 %v890_v1  ;;  %v2154_v2 = vadd.f32 %v740_v52, %v2090_v40  ;;  %v742_v41 = vpop.f32.mrb[2].mxu1 }
 0x205   :  { %v1618_v46 = vpop.eup %1617  ;;  %v980_v37 = vmul.f32 %v1616_v22, %v2096_v4  ;;  %v1359_v44 = vmul.f32 -1.442695, %v2147_v43  ;;  %v2159_v49 = vadd.f32 %v742_v41, %v2087_v57  ;;  %v744_v51 = vpop.f32.mrb[3].mxu1 }
 0x206   :  { %v1620_v55 = vpop.eup %1619  ;;  %v981_v0 = vmul.f32 %v1618_v46, %v2100_v33  ;;  %v1360_v56 = vmul.f32 -1.442695, %v2154_v2  ;;  %v2164_v27 = vadd.f32 %v744_v51, %v2090_v40  ;;  %v1023_v38 = vmul.f32 %v2144_v48, %v979_v42 }
 0x207   :  { %v1622_v58 = vpop.eup %1621  ;;  %v982_v45 = vmul.f32 %v1620_v55, %v2104_v47  ;;  %1637 = vpow2.f32 %v1359_v44  ;;  %v1361_v4 = vmul.f32 -1.442695, %v2159_v49  ;;  %v1024_v59 = vmul.f32 %v2150_v14, %v980_v37 }
 0x208   :  { %v1624_v63 = vpop.eup %1623  ;;  %v891_v7 = vadd.f32 1.0, %v1622_v58  ;;  %1639 = vpow2.f32 %v1360_v56  ;;  %v1025_v33 = vmul.f32 %v2144_v48, %v981_v0  ;;  %v1362_v47 = vmul.f32 -1.442695, %v2164_v27 }
 0x209   :  { %v1626_v8 = vpop.eup %1625  ;;  %v892_v11 = vadd.f32 1.0, %v1624_v63  ;;  %1641 = vpow2.f32 %v1361_v4  ;;  %v1055_v16 = vadd.f32 %v1024_v59, %v1023_v38  ;;  %v1026_v13 = vmul.f32 %v2150_v14, %v982_v45 }
 0x20a   :  { %v1628_v18 = vpop.eup %1627  ;;  %1643 = vrcp.f32 %v891_v7  ;;  %v893_v24 = vadd.f32 1.0, %v1626_v8  ;;  %v748_v19 = vpop.f32.mrb[4].mxu1 }
 0x20b   :  { %v1630_v20 = vpop.eup %1629  ;;  %1645 = vrcp.f32 %v892_v11  ;;  %v894_v53 = vadd.f32 1.0, %v1628_v18  ;;  %v2174_v5 = vadd.f32 %v748_v19, %v2087_v57  ;;  %v750_v21 = vpop.f32.mrb[5].mxu1  ;;  %1056 = vadd.xlane.f32.xlu0 %v1055_v16  ;;  %v1058_v26 = vadd.f32 %v1026_v13, %v1025_v33 }
 0x20c   :  { %v1632_v3 = vpop.eup %1631  ;;  %v983_v28 = vmul.f32 %v1630_v20, %v2109_v50  ;;  %1647 = vrcp.f32 %v893_v24  ;;  %v2178_v29 = vadd.f32 %v750_v21, %v2090_v40  ;;  %v752_v31 = vpop.f32.mrb[6].mxu1 }
 0x20d   :  { %v1634_v10 = vpop.eup %1633  ;;  %v984_v32 = vmul.f32 %v1632_v3, %v2112_v54  ;;  %1649 = vrcp.f32 %v894_v53  ;;  %v1363_v34 = vmul.f32 -1.442695, %v2174_v5  ;;  %v2183_v35 = vadd.f32 %v752_v31, %v2087_v57  ;;  %v754_v6 = vpop.f32.mrb[7].mxu1 }
 0x20e   :  { %v1636_v12 = vpop.eup %1635  ;;  %v985_v1 = vmul.f32 %v1634_v10, %v2116_v30  ;;  %1651 = vpow2.f32 %v1362_v47  ;;  %v1364_v50 = vmul.f32 -1.442695, %v2178_v29  ;;  %v2188_v36 = vadd.f32 %v754_v6, %v2090_v40 }
 0x20f   :  { %v986_v39 = vmul.f32 %v1636_v12, %v2120_v9  ;;  %1653 = vpow2.f32 %v1363_v34  ;;  %v1365_v54 = vmul.f32 -1.442695, %v2183_v35  ;;  %1059 = vadd.xlane.f32.xlu0 %v1058_v26  ;;  %v1027_v52 = vmul.f32 %v2144_v48, %v983_v28 }
 0x210   :  { %1655 = vpow2.f32 %v1364_v50  ;;  %v1366_v22 = vmul.f32 -1.442695, %v2188_v36  ;;  %v1028_v42 = vmul.f32 %v2150_v14, %v984_v32  ;;  %v1029_v30 = vmul.f32 %v2144_v48, %v985_v1 }
 0x211   :  { %v1638_v41 = vpop.eup %1637  ;;  %1657 = vpow2.f32 %v1365_v54  ;;  %v1030_v46 = vmul.f32 %v2150_v14, %v986_v39 }
 0x212   :  { %v1640_v37 = vpop.eup %1639  ;;  %v895_v44 = vadd.f32 1.0, %v1638_v41  ;;  %1659 = vpow2.f32 %v1366_v22  ;;  %v758_v9 = vpop.f32.mrb[8].mxu1  ;;  %v1061_v51 = vadd.f32 %v1028_v42, %v1027_v52 }
 0x213   :  { %v1642_v55 = vpop.eup %1641  ;;  %v896_v0 = vadd.f32 1.0, %v1640_v37  ;;  %v2198_v56 = vadd.f32 %v758_v9, %v2087_v57  ;;  %v760_v38 = vpop.f32.mrb[9].mxu1  ;;  %v1064_v58 = vadd.f32 %v1030_v46, %v1029_v30 }
 0x214   :  { %v1644_v45 = vpop.eup %1643  ;;  %1661 = vrcp.f32 %v895_v44  ;;  %v897_v4 = vadd.f32 1.0, %v1642_v55  ;;  %v2201_v59 = vadd.f32 %v760_v38, %v2090_v40  ;;  %v762_v63 = vpop.f32.mrb[10].mxu1  ;;  %1062 = vadd.xlane.f32.xlu1 %v1061_v51 }
 0x215   :  { %v1646_v7 = vpop.eup %1645  ;;  %v987_v33 = vmul.f32 %v1644_v45, %v2125_v15  ;;  %1663 = vrcp.f32 %v896_v0  ;;  %v1367_v8 = vmul.f32 -1.442695, %v2198_v56  ;;  %v2206_v11 = vadd.f32 %v762_v63, %v2087_v57  ;;  %v764_v16 = vpop.f32.mrb[11].mxu1 }
 0x216   :  { %v1648_v13 = vpop.eup %1647  ;;  %v988_v18 = vmul.f32 %v1646_v7, %v2128_v25  ;;  %1665 = vrcp.f32 %v897_v4  ;;  %v1368_v24 = vmul.f32 -1.442695, %v2201_v59  ;;  %v2211_v47 = vadd.f32 %v764_v16, %v2090_v40 }
 0x217   :  { %v1650_v19 = vpop.eup %1649  ;;  %v989_v20 = vmul.f32 %v1648_v13, %v2132_v17  ;;  %1667 = vpow2.f32 %v1367_v8  ;;  %v1369_v15 = vmul.f32 -1.442695, %v2206_v11  ;;  %v1031_v53 = vmul.f32 %v2144_v48, %v987_v33 }
 0x218   :  { %v1652_v21 = vpop.eup %1651  ;;  %v990_v26 = vmul.f32 %v1650_v19, %v2136_v23  ;;  %1669 = vpow2.f32 %v1368_v24  ;;  %v1370_v25 = vmul.f32 -1.442695, %v2211_v47  ;;  %1065 = vadd.xlane.f32.xlu1 %v1064_v58  ;;  %v1032_v3 = vmul.f32 %v2150_v14, %v988_v18 }
 0x219   :  { %v1654_v28 = vpop.eup %1653  ;;  %v898_v31 = vadd.f32 1.0, %v1652_v21  ;;  %1671 = vpow2.f32 %v1369_v15  ;;  %v1033_v10 = vmul.f32 %v2144_v48, %v989_v20 }
 0x21a   :  { %v1656_v17 = vpop.eup %1655  ;;  %v899_v32 = vadd.f32 1.0, %v1654_v28  ;;  %1673 = vpow2.f32 %v1370_v25  ;;  %v768_v34 = vpop.f32.mrb[12].mxu1  ;;  %v1067_v6 = vadd.f32 %v1032_v3, %v1031_v53  ;;  %v1034_v12 = vmul.f32 %v2150_v14, %v990_v26 }
 0x21b   :  { %v1658_v1 = vpop.eup %1657  ;;  %1675 = vrcp.f32 %v898_v31  ;;  %v900_v23 = vadd.f32 1.0, %v1656_v17  ;;  %v2222_v50 = vadd.f32 %v768_v34, %v2087_v57  ;;  %v770_v39 = vpop.f32.mrb[13].mxu1 }
 0x21c   :  { %v1660_v54 = vpop.eup %1659  ;;  %1677 = vrcp.f32 %v899_v32  ;;  %v901_v52 = vadd.f32 1.0, %v1658_v1  ;;  %v2225_v22 = vadd.f32 %v770_v39, %v2090_v40  ;;  %v772_v42 = vpop.f32.mrb[14].mxu1  ;;  %1068 = vadd.xlane.f32.xlu0 %v1067_v6  ;;  %v1070_v30 = vadd.f32 %v1034_v12, %v1033_v10 }
 0x21d   :  { %1679 = vrcp.f32 %v900_v23  ;;  %v902_v41 = vadd.f32 1.0, %v1660_v54  ;;  %v1371_v46 = vmul.f32 -1.442695, %v2222_v50  ;;  %v2229_v37 = vadd.f32 %v772_v42, %v2087_v57  ;;  %v774_v44 = vpop.f32.mrb[15].mxu1 }
 0x21e   :  { %v1662_v9 = vpop.eup %1661  ;;  %1681 = vrcp.f32 %v901_v52  ;;  %v1372_v51 = vmul.f32 -1.442695, %v2225_v22  ;;  %v2233_v55 = vadd.f32 %v774_v44, %v2090_v40  ;;  %1071 = vadd.xlane.f32.xlu1 %v1070_v30 }
 0x21f   :  { %v1664_v0 = vpop.eup %1663  ;;  %v991_v38 = vmul.f32 %v1662_v9, %v2147_v43  ;;  %1683 = vrcp.f32 %v902_v41  ;;  %v1373_v58 = vmul.f32 -1.442695, %v2229_v37 }
 0x220   :  { %v1666_v45 = vpop.eup %1665  ;;  %v992_v4 = vmul.f32 %v1664_v0, %v2154_v2  ;;  %1685 = vpow2.f32 %v1371_v46  ;;  %v1374_v63 = vmul.f32 -1.442695, %v2233_v55 }
 0x221   :  { %v1668_v7 = vpop.eup %1667  ;;  %v993_v33 = vmul.f32 %v1666_v45, %v2159_v49  ;;  %1687 = vpow2.f32 %v1372_v51  ;;  %v1035_v8 = vmul.f32 %v2144_v48, %v991_v38 }
 0x222   :  { %v1670_v16 = vpop.eup %1669  ;;  %v903_v13 = vadd.f32 1.0, %v1668_v7  ;;  %1689 = vpow2.f32 %v1373_v58  ;;  %v778_v18 = vpop.f32.mrb[16].mxu1  ;;  %v1036_v43 = vmul.f32 %v2150_v14, %v992_v4 }
 0x223   :  { %v1672_v24 = vpop.eup %1671  ;;  %v904_v19 = vadd.f32 1.0, %v1670_v16  ;;  %1691 = vpow2.f32 %v1374_v63  ;;  %v2243_v2 = vadd.f32 %v778_v18, %v2087_v57  ;;  %v780_v20 = vpop.f32.mrb[17].mxu1  ;;  %v1037_v15 = vmul.f32 %v2144_v48, %v993_v33 }
 0x224   :  { %v1674_v53 = vpop.eup %1673  ;;  %1693 = vrcp.f32 %v903_v13  ;;  %v905_v49 = vadd.f32 1.0, %v1672_v24  ;;  %v2247_v21 = vadd.f32 %v780_v20, %v2090_v40  ;;  %v782_v26 = vpop.f32.mrb[18].mxu1  ;;  %v1073_v25 = vadd.f32 %v1036_v43, %v1035_v8 }
 0x225   :  { %v1676_v3 = vpop.eup %1675  ;;  %1695 = vrcp.f32 %v904_v19  ;;  %v906_v28 = vadd.f32 1.0, %v1674_v53  ;;  %v1375_v31 = vmul.f32 -1.442695, %v2243_v2  ;;  %v2251_v10 = vadd.f32 %v782_v26, %v2087_v57  ;;  %v784_v17 = vpop.f32.mrb[19].mxu1 }
 0x226   :  { %v1678_v32 = vpop.eup %1677  ;;  %v994_v34 = vmul.f32 %v1676_v3, %v2164_v27  ;;  %1697 = vrcp.f32 %v905_v49  ;;  %v1376_v6 = vmul.f32 -1.442695, %v2247_v21  ;;  %v2256_v12 = vadd.f32 %v784_v17, %v2090_v40  ;;  %1074 = vadd.xlane.f32.xlu0 %v1073_v25 }
 0x227   :  { %v1680_v1 = vpop.eup %1679  ;;  %v995_v23 = vmul.f32 %v1678_v32, %v2174_v5  ;;  %1699 = vrcp.f32 %v906_v28  ;;  %v1377_v39 = vmul.f32 -1.442695, %v2251_v10 }
 0x228   :  { %v1682_v54 = vpop.eup %1681  ;;  %v996_v57 = vmul.f32 %v1680_v1, %v2178_v29  ;;  %1701 = vpow2.f32 %v1375_v31  ;;  %v1378_v52 = vmul.f32 -1.442695, %v2256_v12  ;;  %v1038_v27 = vmul.f32 %v2150_v14, %v994_v34 }
 0x229   :  { %v1684_v42 = vpop.eup %1683  ;;  %v997_v30 = vmul.f32 %v1682_v54, %v2183_v35  ;;  %1703 = vpow2.f32 %v1376_v6  ;;  %v1039_v40 = vmul.f32 %v2144_v48, %v995_v23  ;;  %v1103_v35 = vld [vmem:[#allocation2] sm:$0x1] }
 0x22a   :  { %v1686_v41 = vpop.eup %1685  ;;  %v998_v5 = vmul.f32 %v1684_v42, %v2188_v36  ;;  %1705 = vpow2.f32 %v1377_v39  ;;  %v1076_v46 = vadd.f32 %v1038_v27, %v1037_v15  ;;  %v1040_v44 = vmul.f32 %v2150_v14, %v996_v57 }
 0x22b   :  { %v1688_v9 = vpop.eup %1687  ;;  %v907_v29 = vadd.f32 1.0, %v1686_v41  ;;  %1707 = vpow2.f32 %v1378_v52  ;;  %v1041_v51 = vmul.f32 %v2144_v48, %v997_v30 }
 0x22c   :  { %v1690_v0 = vpop.eup %1689  ;;  %v908_v38 = vadd.f32 1.0, %v1688_v9  ;;  %1077 = vadd.xlane.f32.xlu0 %v1076_v46  ;;  %v1079_v58 = vadd.f32 %v1040_v44, %v1039_v40  ;;  %v1042_v45 = vmul.f32 %v2150_v14, %v998_v5 }
 0x22d   :  { %v1692_v4 = vpop.eup %1691  ;;  %1709 = vrcp.f32 %v907_v29  ;;  %v909_v63 = vadd.f32 1.0, %v1690_v0 }
 0x22e   :  { %v1694_v36 = vpop.eup %1693  ;;  %1711 = vrcp.f32 %v908_v38  ;;  %v910_v7 = vadd.f32 1.0, %v1692_v4  ;;  %v1082_v33 = vadd.f32 %v1042_v45, %v1041_v51 }
 0x22f   :  { %v1696_v8 = vpop.eup %1695  ;;  %v999_v16 = vmul.f32 %v1694_v36, %v2198_v56  ;;  %1713 = vrcp.f32 %v909_v63  ;;  %1106 = vperm.xlu1 %1416, %v1103_v35  }
 0x230   :  { %v1698_v13 = vpop.eup %1697  ;;  %v1000_v18 = vmul.f32 %v1696_v8, %v2201_v59  ;;  %1715 = vrcp.f32 %v910_v7  ;;  %1080 = vadd.xlane.f32.xlu0 %v1079_v58  ;;  %v2294_v7 = vand.u32 127, %v72_v60 }
 0x231   :  { %v1700_v43 = vpop.eup %1699  ;;  %v1001_v24 = vmul.f32 %v1698_v13, %v2206_v11  ;;  %v1043_v19 = vmul.f32 %v2144_v48, %v999_v16 }
 0x232   :  { %v1702_v20 = vpop.eup %1701  ;;  %v1002_v15 = vmul.f32 %v1700_v43, %v2211_v47  ;;  %v1044_v53 = vmul.f32 %v2150_v14, %v1000_v18  ;;  %v1158_v16 = vadd.s32 4294967280, %v2294_v7 }
 0x233   :  { %v1704_v49 = vpop.eup %1703  ;;  %v911_v26 = vadd.f32 1.0, %v1702_v20  ;;  %v1045_v56 = vmul.f32 %v2144_v48, %v1001_v24  ;;  %v1149_v24 = vsub.s32 %v2294_v7, %v1906_v61 }
 0x234   :  { %v1706_v25 = vpop.eup %1705  ;;  %v912_v3 = vadd.f32 1.0, %v1704_v49  ;;  %1083 = vadd.xlane.f32.xlu0 %v1082_v33  ;;  %v1085_v59 = vadd.f32 %v1044_v53, %v1043_v19  ;;  %v1046_v28 = vmul.f32 %v2150_v14, %v1002_v15  ;;  %v1161_v20 = vsub.s32 %v1158_v16, %v1906_v61 }
 0x235   :  { %v1708_v31 = vpop.eup %1707  ;;  %1717 = vrcp.f32 %v911_v26  ;;  %v913_v11 = vadd.f32 1.0, %v1706_v25  ;;  %v1165_v53 = vadd.s32 4294967272, %v2294_v7 }
 0x236   :  { %1719 = vrcp.f32 %v912_v3  ;;  %v914_v17 = vadd.f32 1.0, %v1708_v31  ;;  %v1088_v32 = vadd.f32 %v1046_v28, %v1045_v56  ;;  %v1172_v56 = vadd.s32 4294967264, %v2294_v7 }
 0x237   :  { %v1710_v34 = vpop.eup %1709  ;;  %1721 = vrcp.f32 %v913_v11  ;;  %v1179_v31 = vadd.s32 4294967256, %v2294_v7 }
 0x238   :  { %v1712_v47 = vpop.eup %1711  ;;  %v1003_v6 = vmul.f32 %v1710_v34, %v2222_v50  ;;  %1723 = vrcp.f32 %v914_v17  ;;  %1086 = vadd.xlane.f32.xlu0 %v1085_v59  ;;  %v1168_v59 = vsub.s32 %v1165_v53, %v1906_v61 }
 0x239   :  { %v1714_v1 = vpop.eup %1713  ;;  %v1004_v23 = vmul.f32 %v1712_v47, %v2225_v22  ;;  %v1186_v47 = vadd.s32 4294967248, %v2294_v7 }
 0x23a   :  { %v1716_v39 = vpop.eup %1715  ;;  %v1005_v54 = vmul.f32 %v1714_v1, %v2229_v37  ;;  %v1047_v57 = vmul.f32 %v2144_v48, %v1003_v6 }
 0x23b   :  { %v1006_v52 = vmul.f32 %v1716_v39, %v2233_v55  ;;  %v1048_v27 = vmul.f32 %v2150_v14, %v1004_v23  ;;  %v1182_v23 = vsub.s32 %v1179_v31, %v1906_v61 }
 0x23c   :  { %v1049_v42 = vmul.f32 %v2144_v48, %v1005_v54 }
 0x23d   :  { %v1091_v30 = vadd.f32 %v1048_v27, %v1047_v57  ;;  %v1050_v40 = vmul.f32 %v2150_v14, %v1006_v52  ;;  %v1193_v57 = vadd.s32 4294967240, %v2294_v7  ;;  %v1189_v27 = vsub.s32 %v1186_v47, %v1906_v61 }
 0x23f   :  { %v1718_v50 = vpop.eup %1717  ;;  %1092 = vadd.xlane.f32.xlu0 %v1091_v30  ;;  %v1094_v41 = vadd.f32 %v1050_v40, %v1049_v42  ;;  %v1200_v30 = vadd.s32 4294967232, %v2294_v7 }
 0x240   :  { %v1720_v5 = vpop.eup %1719  ;;  %v1007_v22 = vmul.f32 %v1718_v50, %v2243_v2  ;;  %v1207_v50 = vadd.s32 4294967224, %v2294_v7 }
 0x241   :  { %v1722_v46 = vpop.eup %1721  ;;  %v1008_v37 = vmul.f32 %v1720_v5, %v2247_v21 }
 0x242   :  { %v1724_v44 = vpop.eup %1723  ;;  %v1009_v9 = vmul.f32 %v1722_v46, %v2251_v10  ;;  %v1051_v55 = vmul.f32 %v2144_v48, %v1007_v22  ;;  %v1196_v22 = vsub.s32 %v1193_v57, %v1906_v61 }
 0x243   :  { %v1010_v29 = vmul.f32 %v1724_v44, %v2256_v12  ;;  %1095 = vadd.xlane.f32.xlu0 %v1094_v41  ;;  %v1052_v51 = vmul.f32 %v2150_v14, %v1008_v37  ;;  %v1214_v41 = vadd.s32 4294967216, %v2294_v7  ;;  %v1203_v44 = vsub.s32 %v1200_v30, %v1906_v61 }
 0x244   :  { %v1053_v0 = vmul.f32 %v2144_v48, %v1009_v9 }
 0x245   :  { %v1097_v38 = vadd.f32 %v1052_v51, %v1051_v55  ;;  %v1054_v58 = vmul.f32 %v2150_v14, %v1010_v29  ;;  %v1151_v14 = vadd.s32 4294967288, %v2294_v7  ;;  %v1210_v29 = vsub.s32 %v1207_v50, %v1906_v61 }
 0x247   :  { %1098 = vadd.xlane.f32.xlu0 %v1097_v38  ;;  %v1100_v2 = vadd.f32 %v1054_v58, %v1053_v0  ;;  %v1154_v60 = vsub.s32 %v1151_v14, %v1906_v61  ;;  %v1221_v0 = vadd.s32 4294967208, %v2294_v7  ;;  %v1217_v58 = vsub.s32 %v1214_v41, %v1906_v61 }
 0x24b   :  { %1101 = vadd.xlane.f32.xlu0 %v1100_v2 }
 0x253   :  { %1089 = vadd.xlane.f32.xlu1 %v1088_v32  ;;  %v1175_v32 = vsub.s32 %v1172_v56, %v1906_v61 }
 0x298   :  { %v1057_v21 = vpop.xlane.xlu0 %1056 }
 0x29c   :  { %v1060_v35 = vpop.xlane.xlu0 %1059 }
 0x2a1   :  { %v1063_v45 = vpop.xlane.xlu1 %1062 }
 0x2a5   :  { %v1066_v63 = vpop.xlane.xlu1 %1065 }
 0x2a9   :  { %v1069_v10 = vpop.xlane.xlu0 %1068 }
 0x2ab   :  { %v1072_v36 = vpop.xlane.xlu1 %1071 }
 0x2af   :  { %v1107_v33 = vpop.permute.xlu1 %1106 }
 0x2b0   :  { %v2297_v8 = vrot.slane %v1107_v33, %v1909_v62  ;;  %v1224_v33 = vsub.s32 %v1221_v0, %v1906_v61 }
 0x2b2   :  { %v1113_v18 = vadd.f32 %v2297_v8, %v1057_v21  ;;  %v1114_v43 = vadd.f32 %v2297_v8, %v1060_v35  ;;  %v1115_v19 = vadd.f32 %v2297_v8, %v1063_v45  ;;  %v1116_v25 = vadd.f32 %v2297_v8, %v1066_v63 }
 0x2b3   :  { %v1075_v4 = vpop.xlane.xlu0 %1074  ;;  %v1117_v11 = vadd.f32 %v2297_v8, %v1069_v10  ;;  %v1118_v6 = vadd.f32 %v2297_v8, %v1072_v36  ;;  %v1228_v21 = vadd.s32 4294967200, %v2294_v7  ;;  %v1235_v45 = vadd.s32 4294967192, %v2294_v7 }
 0x2b4   :  { %v1150_v62 = vrot.slane %v1113_v18, %v1149_v24  ;;  %v1155_v15 = vrot.slane %v1114_v43, %v1154_v60  ;;  %v1162_v26 = vrot.slane %v1115_v19, %v1161_v20  ;;  %v1169_v34 = vrot.slane %v1116_v25, %v1168_v59 }
 0x2b5   :  { %v1176_v39 = vrot.slane %v1117_v11, %v1175_v32  ;;  %v1119_v42 = vadd.f32 %v2297_v8, %v1075_v4  ;;  %v1183_v40 = vrot.slane %v1118_v6, %v1182_v23  ;;  %v1242_v10 = vadd.s32 4294967184, %v2294_v7 }
 0x2b6   :  { %v1157_v3 = vsel %vm1156_vm1, %v1155_v15, %v1150_v62  ;;  %v1249_v63 = vadd.s32 4294967176, %v2294_v7  ;;  %v1231_v14 = vsub.s32 %v1228_v21, %v1906_v61  ;;  %v1238_v43 = vsub.s32 %v1235_v45, %v1906_v61 }
 0x2b7   :  { %v1164_v17 = vsel %vm1163_vm2, %v1162_v26, %v1157_v3  ;;  %v1190_v37 = vrot.slane %v1119_v42, %v1189_v27  ;;  %v1245_v60 = vsub.s32 %v1242_v10, %v1906_v61 }
 0x2b8   :  { %v1171_v1 = vsel %vm1170_vm3, %v1169_v34, %v1164_v17  ;;  %v1252_v62 = vsub.s32 %v1249_v63, %v1906_v61 }
 0x2b9   :  { %v1078_v12 = vpop.xlane.xlu0 %1077  ;;  %v1178_v52 = vsel %vm1177_vm4, %v1176_v39, %v1171_v1 }
 0x2ba   :  { %v1185_v5 = vsel %vm1184_vm5, %v1183_v40, %v1178_v52  ;;  %v1120_v46 = vadd.f32 %v2297_v8, %v1078_v12 }
 0x2bb   :  { %v1192_v38 = vsel %vm1191_vm6, %v1190_v37, %v1185_v5 }
 0x2bc   :  { %v1197_v35 = vrot.slane %v1120_v46, %v1196_v22 }
 0x2bd   :  { %v1081_v48 = vpop.xlane.xlu0 %1080 }
 0x2be   :  { %v1121_v9 = vadd.f32 %v2297_v8, %v1081_v48  ;;  %v1199_v36 = vsel %vm1198_vm7, %v1197_v35, %v1192_v38 }
 0x2c0   :  { %v1204_v4 = vrot.slane %v1121_v9, %v1203_v44 }
 0x2c1   :  { %v1084_v13 = vpop.xlane.xlu0 %1083 }
 0x2c2   :  { %v1122_v51 = vadd.f32 %v2297_v8, %v1084_v13  ;;  %v1206_v19 = vsel %vm1205_vm8, %v1204_v4, %v1199_v36 }
 0x2c4   :  { %v1211_v12 = vrot.slane %v1122_v51, %v1210_v29 }
 0x2c5   :  { %v1087_v49 = vpop.xlane.xlu0 %1086 }
 0x2c6   :  { %v1123_v2 = vadd.f32 %v2297_v8, %v1087_v49  ;;  %v1213_v15 = vsel %vm1212_vm9, %v1211_v12, %v1206_v19 }
 0x2c8   :  { %v1218_v48 = vrot.slane %v1123_v2, %v1217_v58 }
 0x2ca   :  { %v1220_v26 = vsel %vm1219_vm10, %v1218_v48, %v1213_v15 }
 0x2cc   :  { %v1093_v28 = vpop.xlane.xlu0 %1092 }
 0x2cd   :  { %v1125_v16 = vadd.f32 %v2297_v8, %v1093_v28 }
 0x2cf   :  { %v1232_v56 = vrot.slane %v1125_v16, %v1231_v14 }
 0x2d0   :  { %v1096_v54 = vpop.xlane.xlu0 %1095 }
 0x2d1   :  { %v1126_v24 = vadd.f32 %v2297_v8, %v1096_v54 }
 0x2d3   :  { %v1239_v25 = vrot.slane %v1126_v24, %v1238_v43 }
 0x2d4   :  { %v1099_v55 = vpop.xlane.xlu0 %1098 }
 0x2d5   :  { %v1127_v20 = vadd.f32 %v2297_v8, %v1099_v55 }
 0x2d7   :  { %v1246_v59 = vrot.slane %v1127_v20, %v1245_v60 }
 0x2d8   :  { %v1102_v13 = vpop.xlane.xlu0 %1101 }
 0x2d9   :  { %v1128_v53 = vadd.f32 %v2297_v8, %v1102_v13 }
 0x2db   :  { %v1253_v61 = vrot.slane %v1128_v53, %v1252_v62 }
 0x2e0   :  { %v1090_v18 = vpop.xlane.xlu1 %1089 }
 0x2e1   :  { %v1124_v7 = vadd.f32 %v2297_v8, %v1090_v18 }
 0x2e3   :  { %v1225_v49 = vrot.slane %v1124_v7, %v1224_v33 }
 0x2e5   :  { %v1227_v3 = vsel %vm1226_vm11, %v1225_v49, %v1220_v26 }
 0x2e6   :  { %v1234_v28 = vsel %vm1233_vm12, %v1232_v56, %v1227_v3 }
 0x2e7   :  { %v1241_v31 = vsel %vm1240_vm13, %v1239_v25, %v1234_v28 }
 0x2e8   :  { %v1248_v11 = vsel %vm1247_vm14, %v1246_v59, %v1241_v31 }
 0x2e9   :  { %v1255_v17 = vsel %vm1254_vm15, %v1253_v61, %v1248_v11 }
 0x2ea   :  { %1257 = vst [vmem:[#allocation6] sm:$0x1] %v1255_v17 }
 0x2eb   :  { %1758 = shalt.err (!%p1755_p12)
}
 0x2ec   :  { %s1759_s9 = scalar_lea.hbm %s2369_s7, 16 }
 0x2ed   :  { %p1760_p13 = scmp.ne.s32.totalorder %s2369_s7, %s1759_s9  ;;  %p1763_p0 = scmp.lt.u32.totalorder %s1759_s9, %s2369_s7 }
 0x2ef   :  { %p1765_p1 = pnand %p1763_p0, %p1760_p13 }
 0x2f1   :  { %1768 = shalt.err (!%p1765_p1)
}
 0x2f2   :  { %1267 = dma.vmem_to_hbm [thread:$0]  %s1265_s27, 16, %s2369_s7, [#allocation5]  }
 0x2f3   :  { %1771 = dma.done.wait [#allocation5], 16  }
 0x2f4   :  { %1772 = vsyncadd [#allocation5], 4294967280 }
 0x2f5   :  { %1271 = vsyncpa [#allocation4], 1 }
 0x2f6   :  { %1272 = vsyncpa [#allocation5], 1 }

</bundles_post_ra>
